<compile_context>
chip_gen: v7x
topology: tpu7x:2x2x1
jax: 0.10.0
libtpu: 0.0.40
codegen_flags: <defaults>
</compile_context>

<pallas_src>
import functools

import numpy as np
import jax
import jax.numpy as jnp
from jax import lax
from jax.experimental import pallas as pl
from jax.experimental.pallas import tpu as pltpu

NUM_GROUPS = 8
EPS = 1e-5

# bf16 MXU operands (f32 accumulation) per v6e/v7x feedback.  Set to jnp.float32 for
# bit-accurate (<=2e-3) agreement with the f32 reference.
MXU_DTYPE = jnp.bfloat16


def _round_up(x, m):
    return ((x + m - 1) // m) * m


# ---------------------------------------------------------------------------
# Host-side constants
# ---------------------------------------------------------------------------
def bilinear_matrix(in_size, out_size):
    """Row-stochastic (out, in) matrix: PyTorch bilinear, align_corners=False."""
    scale = in_size / out_size
    o = np.arange(out_size)
    src = np.clip((o + 0.5) * scale - 0.5, 0.0, None)
    i0 = np.minimum(np.floor(src).astype(np.int64), in_size - 1)
    i1 = np.minimum(i0 + 1, in_size - 1)
    frac = (src - i0).astype(np.float32)
    r = np.zeros((out_size, in_size), dtype=np.float32)
    r[o, i0] += (1.0 - frac)
    r[o, i1] += frac
    return r


def _deconv_resize_constants(h1, w1, w1p, h2, w2, w2p):
    """Parity validity masks + combined (Kronecker) resize matrices.

    rcomb[(k*m1 + p*w1p + q), (i*w2p + j)] = Rh_par[i, p] * Rw_par[q, j]
    with parity order k in [ee, eo, oe, oo].  Rows for invalid parity lanes and
    columns in the output pad ring are exactly zero.
    """
    hd, wd = 2 * h1 - 1, 2 * w1 - 1
    m1 = h1 * w1p
    lp2 = (h2 + 3) * w2p
    rh = bilinear_matrix(hd, h2)                              # (H2, Hd)
    rw = bilinear_matrix(wd, w2)                              # (W2, Wd)
    rh_pad = np.zeros((2, h2 + 3, h1), np.float32)            # rows 1..H2 = data (top/bot pad)
    rh_pad[0, 1:h2 + 1, :h1] = rh[:, 0::2]
    rh_pad[1, 1:h2 + 1, :h1 - 1] = rh[:, 1::2]
    rw_pad = np.zeros((2, w1p, w2p), np.float32)              # cols 1..W2 = data (left/right pad)
    rw_pad[0, :w1, 1:w2 + 1] = rw[:, 0::2].T
    rw_pad[1, :w1 - 1, 1:w2 + 1] = rw[:, 1::2].T

    parities = [(0, 0), (0, 1), (1, 0), (1, 1)]               # ee, eo, oe, oo
    valid = [(h1, w1), (h1, w1 - 1), (h1 - 1, w1), (h1 - 1, w1 - 1)]
    row = np.arange(m1) // w1p
    col = np.arange(m1) % w1p
    rcomb = np.zeros((4, m1, lp2), np.float32)
    dmask = np.zeros((4, m1), np.float32)
    for k, (hp, wp) in enumerate(parities):
        rcomb[k] = np.einsum("ip,qj->pqij", rh_pad[hp], rw_pad[wp]).reshape(m1, lp2)
        vh, vw = valid[k]
        dmask[k] = ((row < vh) & (col < vw)).astype(np.float32)
    return dmask.reshape(1, 4 * m1), rcomb.reshape(4 * m1, lp2)


def _group_projector(c, groups):
    cg = c // groups
    idx = np.arange(c) // cg
    return (idx[:, None] == idx[None, :]).astype(np.float32)


# ---------------------------------------------------------------------------
# Fused kernel: deconv(sub-pixel) + ELU + GN  ->  resize (1 matmul)  ->
#               (implicit cat) 3x3 conv (K-stacked taps, 1 matmul) + ELU + GN
# One sample per grid step; everything stays in VMEM.
# ---------------------------------------------------------------------------
def _upblock_kernel(x1_ref, x2_ref, wst_ref, dpar_ref, dmask_ref, projd_ref,
                    rcomb_ref, wcv_ref, cpar_ref, cmask_ref, projc_ref, o_ref, *,
                    ch, c_out, w1p, w2p, m1, l2, count_d, count_c):
    # ---- stage 1: ConvTranspose2d(3, s=2, p=1) via sub-pixel decomposition ----
    x1 = x1_ref[0]                                            # (Cin, (H1+2)*W1p)
    # one MXU matmul for all 9 sub-pixel taps: (9*Ch, Cin) @ (Cin, Lp1)
    p = jnp.dot(wst_ref[...], x1, preferred_element_type=jnp.float32)

    def tap(t, dh, dw):
        off = dh * w1p + dw                                   # flat shift trick
        return p[t * ch:(t + 1) * ch, off:off + m1]

    # four parity grids [ee, eo, oe, oo] concatenated along lanes (offsets are 128-aligned)
    # so ELU / GN / resize each run once over a single (Ch, 4*m1) slab.
    a = jnp.concatenate(
        [tap(0, 0, 0),
         tap(1, 0, 0) + tap(2, 0, 1),
         tap(3, 0, 0) + tap(4, 1, 0),
         tap(5, 0, 0) + tap(6, 0, 1) + tap(7, 1, 0) + tap(8, 1, 1)], axis=1)

    dbias = dpar_ref[:, 0:1]
    dgamma = dpar_ref[:, 1:2]
    dbeta = dpar_ref[:, 2:3]
    t1 = a + dbias
    # ELU: exp(min(t,0))-1 (clamped dead branch never overflows; abs error vs expm1 is
    # ~6e-8, far below tolerance, and exp has a guaranteed Mosaic/EUP lowering).
    act1 = jnp.where(t1 > 0, t1, jnp.exp(jnp.minimum(t1, 0.0)) - 1.0)

    # Single-pass masked GroupNorm statistics (f32).  Invalid lanes are excluded here and
    # later annihilated by the exactly-zero rows of rcomb (asserted host-side).
    dmask = dmask_ref[...] > 0.5                              # (1, 4*m1) bool
    am = jnp.where(dmask, act1, 0.0)
    s1 = jnp.sum(am, axis=1, keepdims=True)
    q1 = jnp.sum(am * am, axis=1, keepdims=True)
    gsum1 = jnp.dot(projd_ref[...], jnp.concatenate([s1, q1], axis=1),
                    preferred_element_type=jnp.float32) * (1.0 / count_d)
    mean1 = gsum1[:, 0:1]
    var1 = gsum1[:, 1:2] - mean1 * mean1
    scale1 = lax.rsqrt(var1 + EPS) * dgamma
    shift1 = dbeta - mean1 * scale1
    n1 = act1 * scale1 + shift1                               # (Ch, 4*m1) f32

    # ---- stage 2: bilinear resize as ONE matmul (parity interleave + lerp + pad folded
    #               into rcomb); output already has the zero pad ring for the 3x3 conv ----
    y = jnp.dot(n1.astype(rcomb_ref.dtype), rcomb_ref[...],
                preferred_element_type=jnp.float32)           # (Ch, (H2+3)*W2p) f32

    # ---- stage 3: (implicit cat) + Conv2d(3x3, p=1): 9 taps stacked along K so the MXU
    #               does the accumulation in a single (Cout, 9*Cin_tot) @ (9*Cin_tot, L2) ----
    x2 = x2_ref[0]                                            # (Cin2p, Lp2) f32 (zero-padded chans)
    xy = jnp.concatenate([y, x2], axis=0)                     # (Cin_tot, Lp2), 8-aligned rows
    # NOTE: tap slices are lane-unaligned (W2p is not a multiple of 128 at these sizes), so
    # a kw-shift cache would not remove the relayouts here; revisit for 128-wide production.
    stk = jnp.concatenate(
        [xy[:, kh * w2p + kw: kh * w2p + kw + l2] for kh in range(3) for kw in range(3)],
        axis=0)                                               # (9*Cin_tot, L2) f32
    z = jnp.dot(wcv_ref[...], stk.astype(wcv_ref.dtype),
                preferred_element_type=jnp.float32)           # (Cout, L2) f32

    cbias = cpar_ref[:, 0:1]
    cgamma = cpar_ref[:, 1:2]
    cbeta = cpar_ref[:, 2:3]
    t2 = z + cbias
    act2 = jnp.where(t2 > 0, t2, jnp.exp(jnp.minimum(t2, 0.0)) - 1.0)

    cmask = cmask_ref[...] > 0.5                              # drop right-pad columns
    bm = jnp.where(cmask, act2, 0.0)
    s2 = jnp.sum(bm, axis=1, keepdims=True)
    q2 = jnp.sum(bm * bm, axis=1, keepdims=True)
    gsum2 = jnp.dot(projc_ref[...], jnp.concatenate([s2, q2], axis=1),
                    preferred_element_type=jnp.float32) * (1.0 / count_c)
    mean2 = gsum2[:, 0:1]
    var2 = gsum2[:, 1:2] - mean2 * mean2
    scale2 = lax.rsqrt(var2 + EPS) * cgamma
    shift2 = cbeta - mean2 * scale2
    o_ref[0] = act2 * scale2 + shift2                         # lane-dense (Cout, L2) store


# ---------------------------------------------------------------------------
# Wrapper: layout plumbing + constants + single pallas_call
# ---------------------------------------------------------------------------
def upblock_forward(x1, x2, params):
    n, c_in, h1, w1 = x1.shape
    _, c_in2, h2, w2 = x2.shape
    ch = params["deconv_b"].shape[0]
    c_out = params["conv_b"].shape[0]
    groups = NUM_GROUPS
    hd, wd = 2 * h1 - 1, 2 * w1 - 1

    w1p = _round_up(w1 + 1, 8)            # >= w1+1 so the flat shift trick never wraps valid lanes
    w2p = _round_up(w2 + 2, 8)
    m1 = h1 * w1p
    lp1 = (h1 + 2) * w1p
    lp2 = (h2 + 3) * w2p
    l2 = h2 * w2p
    c_in2p = _round_up(c_in2, 8)          # channel-pad x2 so sublane concats are tile-aligned
    cin_tot = ch + c_in2p
    count_d = float((ch // groups) * hd * wd)
    count_c = float((c_out // groups) * h2 * w2)
    mxu = MXU_DTYPE

    # --- inputs: channel-first, zero-padded, row-flattened slabs ---
    x1p = jnp.pad(x1.astype(jnp.float32), ((0, 0), (0, 0), (0, 2), (0, w1p - w1)))
    x1pf = x1p.reshape(n, c_in, lp1).astype(mxu)
    x2p = jnp.pad(x2.astype(jnp.float32),
                  ((0, 0), (0, c_in2p - c_in2), (1, 2), (1, w2p - w2 - 1)))
    x2pf = x2p.reshape(n, c_in2p, lp2)    # stays f32; cast happens with the K-stack in-kernel

    # --- deconv sub-pixel weight stack (one MXU matmul for all 9 taps) ---
    dw = params["deconv_w"].astype(jnp.float32)               # (Cin, Ch, 3, 3)
    tap_order = [(1, 1), (1, 2), (1, 0), (2, 1), (0, 1), (2, 2), (2, 0), (0, 2), (0, 0)]
    w_stack = jnp.concatenate([dw[:, :, kh, kw].T for kh, kw in tap_order],
                              axis=0).astype(mxu)             # (9*Ch, Cin)

    # --- conv weights: channel order [y ; x2 ; zero-pad], 9 taps stacked along K ---
    cw = params["conv_w"].astype(jnp.float32)                 # (Cout, Cin2 + Ch, 3, 3)
    padz = jnp.zeros((c_out, c_in2p - c_in2), jnp.float32)
    blocks = []
    for kh in range(3):
        for kw in range(3):
            blocks.append(jnp.concatenate([cw[:, c_in2:, kh, kw],
                                           cw[:, :c_in2, kh, kw], padz], axis=1))
    w_conv = jnp.concatenate(blocks, axis=1).astype(mxu)      # (Cout, 9*Cin_tot)

    # --- per-channel GN params packed as (C, 3) = [bias | gamma | beta] ---
    dparams = jnp.stack([params["deconv_b"], params["deconv_gamma"],
                         params["deconv_beta"]], axis=1).astype(jnp.float32)
    cparams = jnp.stack([params["conv_b"], params["conv_gamma"],
                         params["conv_beta"]], axis=1).astype(jnp.float32)

    # --- hoisted constants: validity masks, combined resize matrix, group projectors ---
    dmask_np, rcomb_np = _deconv_resize_constants(h1, w1, w1p, h2, w2, w2p)
    # invariant the kernel relies on: rows of rcomb for invalid parity lanes are exactly 0
    assert np.all(rcomb_np[dmask_np.reshape(-1) < 0.5, :] == 0.0), \
        "resize matrix must annihilate invalid parity-grid lanes"
    dmask = jnp.asarray(dmask_np)                             # (1, 4*m1) f32
    rcomb = jnp.asarray(rcomb_np).astype(mxu)                 # (4*m1, Lp2)
    cmask = jnp.asarray((np.arange(l2).reshape(1, l2) % w2p < w2).astype(np.float32))
    proj_d = jnp.asarray(_group_projector(ch, groups))
    proj_c = jnp.asarray(_group_projector(c_out, groups))

    kern = functools.partial(_upblock_kernel, ch=ch, c_out=c_out, w1p=w1p, w2p=w2p,
                             m1=m1, l2=l2, count_d=count_d, count_c=count_c)

    flops = int(2 * n * ((9 * ch) * c_in * lp1 + ch * (4 * m1) * lp2
                         + c_out * (9 * cin_tot) * l2))
    transc = int(n * (ch * 4 * m1 + c_out * l2))
    operands = (x1pf, x2pf, w_stack, dparams, dmask, proj_d, rcomb, w_conv,
                cparams, cmask, proj_c)
    bytes_acc = int(sum(int(op.size) * op.dtype.itemsize for op in operands)
                    + n * c_out * l2 * 4)

    z = pl.pallas_call(
        kern,
        out_shape=jax.ShapeDtypeStruct((n, c_out, l2), jnp.float32),
        grid=(n,),
        in_specs=[
            pl.BlockSpec((1, c_in, lp1), lambda i: (i, 0, 0)),        # x1 slab
            pl.BlockSpec((1, c_in2p, lp2), lambda i: (i, 0, 0)),      # x2 slab
            pl.BlockSpec((9 * ch, c_in), lambda i: (0, 0)),           # deconv weight stack
            pl.BlockSpec((ch, 3), lambda i: (0, 0)),                  # deconv bias/gamma/beta
            pl.BlockSpec((1, 4 * m1), lambda i: (0, 0)),              # parity validity mask
            pl.BlockSpec((ch, ch), lambda i: (0, 0)),                 # GN group projector (deconv)
            pl.BlockSpec((4 * m1, lp2), lambda i: (0, 0)),            # combined resize matrix
            pl.BlockSpec((c_out, 9 * cin_tot), lambda i: (0, 0)),     # conv weight (K-stacked)
            pl.BlockSpec((c_out, 3), lambda i: (0, 0)),               # conv bias/gamma/beta
            pl.BlockSpec((1, l2), lambda i: (0, 0)),                  # conv validity mask
            pl.BlockSpec((c_out, c_out), lambda i: (0, 0)),           # GN group projector (conv)
        ],
        out_specs=pl.BlockSpec((1, c_out, l2), lambda i: (i, 0, 0)),
        compiler_params=pltpu.CompilerParams(
            dimension_semantics=("parallel",),
            vmem_limit_bytes=32 * 1024 * 1024),
        cost_estimate=pl.CostEstimate(flops=flops, transcendentals=transc,
                                      bytes_accessed=bytes_acc),
    )(*operands)
    return z.reshape(n, c_out, h2, w2p)[:, :, :, :w2]


# ---------------------------------------------------------------------------
# Pure-JAX reference (correctness check only)
# ---------------------------------------------------------------------------
def _ref_elu(x):
    return jnp.where(x > 0, x, jnp.expm1(x))


def _ref_group_norm(x, gamma, beta, groups=NUM_GROUPS):
    n, c, h, w = x.shape
    xg = x.reshape(n, groups, c // groups, h, w)
    mean = xg.mean(axis=(2, 3, 4), keepdims=True)
    var = xg.var(axis=(2, 3, 4), keepdims=True)
    xn = ((xg - mean) / jnp.sqrt(var + EPS)).reshape(n, c, h, w)
    return xn * gamma[None, :, None, None] + beta[None, :, None, None]


def ref_forward(x1, x2, params):
    _, _, h1, w1 = x1.shape
    _, _, h2, w2 = x2.shape
    hd, wd = 2 * h1 - 1, 2 * w1 - 1
    wt = jnp.transpose(jnp.flip(params["deconv_w"], (2, 3)), (1, 0, 2, 3))
    y = lax.conv_general_dilated(x1, wt, (1, 1), [(1, 1), (1, 1)], lhs_dilation=(2, 2),
                                 dimension_numbers=("NCHW", "OIHW", "NCHW"),
                                 precision=lax.Precision.HIGHEST)
    y = _ref_elu(y + params["deconv_b"][None, :, None, None])
    y = _ref_group_norm(y, params["deconv_gamma"], params["deconv_beta"])
    rh = jnp.asarray(bilinear_matrix(hd, h2))
    rw = jnp.asarray(bilinear_matrix(wd, w2))
    y = jnp.einsum("oh,nchw->ncow", rh, y, precision=lax.Precision.HIGHEST)
    y = jnp.einsum("pw,ncow->ncop", rw, y, precision=lax.Precision.HIGHEST)
    x = jnp.concatenate([x2, y], axis=1)
    z = lax.conv_general_dilated(x, params["conv_w"], (1, 1), [(1, 1), (1, 1)],
                                 dimension_numbers=("NCHW", "OIHW", "NCHW"),
                                 precision=lax.Precision.HIGHEST)
    z = _ref_elu(z + params["conv_b"][None, :, None, None])
    return _ref_group_norm(z, params["conv_gamma"], params["conv_beta"])


# ---------------------------------------------------------------------------
if __name__ == "__main__":
    N, in_size, in_size_2, h_size, out_size = 2, 4, 6, 16, 8   # h_size, out_size % 8 == 0
    H1 = W1 = 8
    H2 = W2 = 16

    key = jax.random.PRNGKey(0)
    ks = jax.random.split(key, 10)
    params = {
        "deconv_w": 0.2 * jax.random.normal(ks[0], (in_size, h_size, 3, 3), jnp.float32),
        "deconv_b": 0.1 * jax.random.normal(ks[1], (h_size,), jnp.float32),
        "deconv_gamma": 1.0 + 0.1 * jax.random.normal(ks[2], (h_size,), jnp.float32),
        "deconv_beta": 0.1 * jax.random.normal(ks[3], (h_size,), jnp.float32),
        "conv_w": 0.2 * jax.random.normal(ks[4], (out_size, h_size + in_size_2, 3, 3), jnp.float32),
        "conv_b": 0.1 * jax.random.normal(ks[5], (out_size,), jnp.float32),
        "conv_gamma": 1.0 + 0.1 * jax.random.normal(ks[6], (out_size,), jnp.float32),
        "conv_beta": 0.1 * jax.random.normal(ks[7], (out_size,), jnp.float32),
    }
    x1 = jax.random.normal(ks[8], (N, in_size, H1, W1), jnp.float32)
    x2 = jax.random.normal(ks[9], (N, in_size_2, H2, W2), jnp.float32)

    fwd = jax.jit(upblock_forward)
    out = jax.block_until_ready(fwd(x1, x2, params))
    ref = jax.block_until_ready(ref_forward(x1, x2, params))

    assert out.shape == (N, out_size, H2, W2), out.shape
    # tolerance: 2e-3 with f32 MXU operands; 2e-2 with bf16 operands (f32 accumulation).
    tol = 2e-3 if MXU_DTYPE == jnp.float32 else 2e-2
    max_err = float(jnp.max(jnp.abs(out - ref)))
    if not bool(jnp.allclose(out, ref, atol=tol, rtol=tol)):
        raise SystemExit(f"mismatch vs reference, max abs err = {max_err}")
    print("KERNEL_OK")
</pallas_src>

<mosaic_0001>
module attributes {stable_mosaic.version = 11 : i64} {
  func.func @_upblock_kernel(%arg0: i32, %arg1: memref<1x4x160xbf16, #tpu.memory_space<vmem>>, %arg2: memref<1x8x456xf32, #tpu.memory_space<vmem>>, %arg3: memref<144x4xbf16, #tpu.memory_space<vmem>>, %arg4: memref<16x3xf32, #tpu.memory_space<vmem>>, %arg5: memref<1x512xf32, #tpu.memory_space<vmem>>, %arg6: memref<16x16xf32, #tpu.memory_space<vmem>>, %arg7: memref<512x456xbf16, #tpu.memory_space<vmem>>, %arg8: memref<8x216xbf16, #tpu.memory_space<vmem>>, %arg9: memref<8x3xf32, #tpu.memory_space<vmem>>, %arg10: memref<1x384xf32, #tpu.memory_space<vmem>>, %arg11: memref<8x8xf32, #tpu.memory_space<vmem>>, %arg12: memref<1x8x384xf32, #tpu.memory_space<vmem>>) attributes {dimension_semantics = [#tpu.dimension_semantics<parallel>], iteration_bounds = array<i64: 2>, scalar_prefetch = 0 : i64, scratch_operands = 0 : i64, tpu.core_type = #tpu.core_type<tc>, window_params = [{transform_indices = @transform_0, window_bounds = array<i64: 1, 4, 160>}, {transform_indices = @transform_1, window_bounds = array<i64: 1, 8, 456>}, {pipeline_mode = #tpu.pipeline_mode<synchronous>, transform_indices = @transform_2, window_bounds = array<i64: 144, 4>}, {pipeline_mode = #tpu.pipeline_mode<synchronous>, transform_indices = @transform_3, window_bounds = array<i64: 16, 3>}, {pipeline_mode = #tpu.pipeline_mode<synchronous>, transform_indices = @transform_4, window_bounds = array<i64: 1, 512>}, {pipeline_mode = #tpu.pipeline_mode<synchronous>, transform_indices = @transform_5, window_bounds = array<i64: 16, 16>}, {pipeline_mode = #tpu.pipeline_mode<synchronous>, transform_indices = @transform_6, window_bounds = array<i64: 512, 456>}, {pipeline_mode = #tpu.pipeline_mode<synchronous>, transform_indices = @transform_7, window_bounds = array<i64: 8, 216>}, {pipeline_mode = #tpu.pipeline_mode<synchronous>, transform_indices = @transform_8, window_bounds = array<i64: 8, 3>}, {pipeline_mode = #tpu.pipeline_mode<synchronous>, transform_indices = @transform_9, window_bounds = array<i64: 1, 384>}, {pipeline_mode = #tpu.pipeline_mode<synchronous>, transform_indices = @transform_10, window_bounds = array<i64: 8, 8>}, {transform_indices = @transform_11, window_bounds = array<i64: 1, 8, 384>}]} {
    %c0 = arith.constant 0 : index
    %c0_0 = arith.constant 0 : index
    %c0_1 = arith.constant 0 : index
    %0 = vector.load %arg1[%c0, %c0_0, %c0_1] : memref<1x4x160xbf16, #tpu.memory_space<vmem>>, vector<1x4x160xbf16>
    %1 = vector.shape_cast %0 : vector<1x4x160xbf16> to vector<4x160xbf16>
    %c0_2 = arith.constant 0 : index
    %c0_3 = arith.constant 0 : index
    %2 = vector.load %arg3[%c0_2, %c0_3] : memref<144x4xbf16, #tpu.memory_space<vmem>>, vector<144x4xbf16>
    %cst = arith.constant dense<0.000000e+00> : vector<144x160xf32>
    %3 = tpu.matmul %2, %1, %cst {dimension_numbers = #tpu.dot_dimension_numbers<[1], [0], [0], [1], [0, 0, 1, 1], [], []>} : vector<144x4xbf16>, vector<4x160xbf16>, vector<144x160xf32> -> vector<144x160xf32>
    %4 = vector.extract_strided_slice %3 {offsets = [0, 0], sizes = [16, 128], strides = [1, 1]} : vector<144x160xf32> to vector<16x128xf32>
    %5 = vector.extract_strided_slice %3 {offsets = [16, 0], sizes = [16, 128], strides = [1, 1]} : vector<144x160xf32> to vector<16x128xf32>
    %6 = vector.extract_strided_slice %3 {offsets = [32, 1], sizes = [16, 128], strides = [1, 1]} : vector<144x160xf32> to vector<16x128xf32>
    %7 = arith.addf %5, %6 : vector<16x128xf32>
    %8 = vector.extract_strided_slice %3 {offsets = [48, 0], sizes = [16, 128], strides = [1, 1]} : vector<144x160xf32> to vector<16x128xf32>
    %9 = vector.extract_strided_slice %3 {offsets = [64, 16], sizes = [16, 128], strides = [1, 1]} : vector<144x160xf32> to vector<16x128xf32>
    %10 = arith.addf %8, %9 : vector<16x128xf32>
    %11 = vector.extract_strided_slice %3 {offsets = [80, 0], sizes = [16, 128], strides = [1, 1]} : vector<144x160xf32> to vector<16x128xf32>
    %12 = vector.extract_strided_slice %3 {offsets = [96, 1], sizes = [16, 128], strides = [1, 1]} : vector<144x160xf32> to vector<16x128xf32>
    %13 = arith.addf %11, %12 : vector<16x128xf32>
    %14 = vector.extract_strided_slice %3 {offsets = [112, 16], sizes = [16, 128], strides = [1, 1]} : vector<144x160xf32> to vector<16x128xf32>
    %15 = arith.addf %13, %14 : vector<16x128xf32>
    %16 = vector.extract_strided_slice %3 {offsets = [128, 17], sizes = [16, 128], strides = [1, 1]} : vector<144x160xf32> to vector<16x128xf32>
    %17 = arith.addf %15, %16 : vector<16x128xf32>
    %18 = tpu.concatenate %4, %7, %10, %17 in 1 : vector<16x128xf32>, vector<16x128xf32>, vector<16x128xf32>, vector<16x128xf32> -> vector<16x512xf32>
    %c0_4 = arith.constant 0 : index
    %c0_5 = arith.constant 0 : index
    %19 = vector.load %arg4[%c0_4, %c0_5] : memref<16x3xf32, #tpu.memory_space<vmem>>, vector<16x1xf32>
    %c0_6 = arith.constant 0 : index
    %c1 = arith.constant 1 : index
    %20 = vector.load %arg4[%c0_6, %c1] : memref<16x3xf32, #tpu.memory_space<vmem>>, vector<16x1xf32>
    %c0_7 = arith.constant 0 : index
    %c2 = arith.constant 2 : index
    %21 = vector.load %arg4[%c0_7, %c2] : memref<16x3xf32, #tpu.memory_space<vmem>>, vector<16x1xf32>
    %22 = vector.broadcast %19 : vector<16x1xf32> to vector<16x512xf32>
    %23 = arith.addf %18, %22 : vector<16x512xf32>
    %cst_8 = arith.constant 0.000000e+00 : f32
    %24 = vector.broadcast %cst_8 : f32 to vector<16x512xf32>
    %25 = arith.cmpf ogt, %23, %24 : vector<16x512xf32>
    %cst_9 = arith.constant 0.000000e+00 : f32
    %26 = vector.broadcast %cst_9 : f32 to vector<16x512xf32>
    %27 = arith.minimumf %23, %26 : vector<16x512xf32>
    %28 = math.exp %27 : vector<16x512xf32>
    %cst_10 = arith.constant 1.000000e+00 : f32
    %29 = vector.broadcast %cst_10 : f32 to vector<16x512xf32>
    %30 = arith.subf %28, %29 : vector<16x512xf32>
    %31 = arith.select %25, %23, %30 : vector<16x512xi1>, vector<16x512xf32>
    %c0_11 = arith.constant 0 : index
    %c0_12 = arith.constant 0 : index
    %32 = vector.load %arg5[%c0_11, %c0_12] : memref<1x512xf32, #tpu.memory_space<vmem>>, vector<1x512xf32>
    %cst_13 = arith.constant 5.000000e-01 : f32
    %33 = vector.broadcast %cst_13 : f32 to vector<1x512xf32>
    %34 = arith.cmpf ogt, %32, %33 : vector<1x512xf32>
    %cst_14 = arith.constant 0.000000e+00 : f32
    %35 = vector.shape_cast %34 : vector<1x512xi1> to vector<1x512xi1>
    %36 = vector.broadcast %35 : vector<1x512xi1> to vector<16x512xi1>
    %37 = vector.broadcast %cst_14 : f32 to vector<16x512xf32>
    %38 = arith.select %36, %31, %37 : vector<16x512xi1>, vector<16x512xf32>
    %cst_15 = arith.constant dense<0.000000e+00> : vector<16xf32>
    %39 = vector.multi_reduction <add>, %38, %cst_15 [1] : vector<16x512xf32> to vector<16xf32>
    %40 = vector.shape_cast %39 : vector<16xf32> to vector<16x1xf32>
    %41 = arith.mulf %38, %38 : vector<16x512xf32>
    %cst_16 = arith.constant dense<0.000000e+00> : vector<16xf32>
    %42 = vector.multi_reduction <add>, %41, %cst_16 [1] : vector<16x512xf32> to vector<16xf32>
    %43 = vector.shape_cast %42 : vector<16xf32> to vector<16x1xf32>
    %c0_17 = arith.constant 0 : index
    %c0_18 = arith.constant 0 : index
    %44 = vector.load %arg6[%c0_17, %c0_18] : memref<16x16xf32, #tpu.memory_space<vmem>>, vector<16x16xf32>
    %45 = tpu.concatenate %40, %43 in 1 : vector<16x1xf32>, vector<16x1xf32> -> vector<16x2xf32>
    %cst_19 = arith.constant dense<0.000000e+00> : vector<16x2xf32>
    %46 = tpu.matmul %44, %45, %cst_19 {dimension_numbers = #tpu.dot_dimension_numbers<[1], [0], [0], [1], [0, 0, 1, 1], [], []>} : vector<16x16xf32>, vector<16x2xf32>, vector<16x2xf32> -> vector<16x2xf32>
    %cst_20 = arith.constant 0.00222222228 : f32
    %47 = vector.broadcast %cst_20 : f32 to vector<16x2xf32>
    %48 = arith.mulf %46, %47 : vector<16x2xf32>
    %49 = vector.extract_strided_slice %48 {offsets = [0, 0], sizes = [16, 1], strides = [1, 1]} : vector<16x2xf32> to vector<16x1xf32>
    %50 = vector.extract_strided_slice %48 {offsets = [0, 1], sizes = [16, 1], strides = [1, 1]} : vector<16x2xf32> to vector<16x1xf32>
    %51 = arith.mulf %49, %49 : vector<16x1xf32>
    %52 = arith.subf %50, %51 : vector<16x1xf32>
    %cst_21 = arith.constant 9.99999974E-6 : f32
    %53 = vector.broadcast %cst_21 : f32 to vector<16x1xf32>
    %54 = arith.addf %52, %53 : vector<16x1xf32>
    %55 = math.rsqrt %54 : vector<16x1xf32>
    %56 = arith.mulf %55, %20 : vector<16x1xf32>
    %57 = arith.mulf %49, %56 : vector<16x1xf32>
    %58 = arith.subf %21, %57 : vector<16x1xf32>
    %59 = vector.broadcast %56 : vector<16x1xf32> to vector<16x512xf32>
    %60 = arith.mulf %31, %59 : vector<16x512xf32>
    %61 = vector.broadcast %58 : vector<16x1xf32> to vector<16x512xf32>
    %62 = arith.addf %60, %61 : vector<16x512xf32>
    %63 = arith.truncf %62 : vector<16x512xf32> to vector<16x512xbf16>
    %c0_22 = arith.constant 0 : index
    %c0_23 = arith.constant 0 : index
    %64 = vector.load %arg7[%c0_22, %c0_23] : memref<512x456xbf16, #tpu.memory_space<vmem>>, vector<512x456xbf16>
    %cst_24 = arith.constant dense<0.000000e+00> : vector<16x456xf32>
    %65 = tpu.matmul %63, %64, %cst_24 {dimension_numbers = #tpu.dot_dimension_numbers<[1], [0], [0], [1], [0, 0, 1, 1], [], []>} : vector<16x512xbf16>, vector<512x456xbf16>, vector<16x456xf32> -> vector<16x456xf32>
    %c0_25 = arith.constant 0 : index
    %c0_26 = arith.constant 0 : index
    %c0_27 = arith.constant 0 : index
    %66 = vector.load %arg2[%c0_25, %c0_26, %c0_27] : memref<1x8x456xf32, #tpu.memory_space<vmem>>, vector<1x8x456xf32>
    %67 = vector.shape_cast %66 : vector<1x8x456xf32> to vector<8x456xf32>
    %68 = tpu.concatenate %65, %67 in 0 : vector<16x456xf32>, vector<8x456xf32> -> vector<24x456xf32>
    %69 = vector.extract_strided_slice %68 {offsets = [0, 0], sizes = [24, 384], strides = [1, 1]} : vector<24x456xf32> to vector<24x384xf32>
    %70 = vector.extract_strided_slice %68 {offsets = [0, 1], sizes = [24, 384], strides = [1, 1]} : vector<24x456xf32> to vector<24x384xf32>
    %71 = vector.extract_strided_slice %68 {offsets = [0, 2], sizes = [24, 384], strides = [1, 1]} : vector<24x456xf32> to vector<24x384xf32>
    %72 = vector.extract_strided_slice %68 {offsets = [0, 24], sizes = [24, 384], strides = [1, 1]} : vector<24x456xf32> to vector<24x384xf32>
    %73 = vector.extract_strided_slice %68 {offsets = [0, 25], sizes = [24, 384], strides = [1, 1]} : vector<24x456xf32> to vector<24x384xf32>
    %74 = vector.extract_strided_slice %68 {offsets = [0, 26], sizes = [24, 384], strides = [1, 1]} : vector<24x456xf32> to vector<24x384xf32>
    %75 = vector.extract_strided_slice %68 {offsets = [0, 48], sizes = [24, 384], strides = [1, 1]} : vector<24x456xf32> to vector<24x384xf32>
    %76 = vector.extract_strided_slice %68 {offsets = [0, 49], sizes = [24, 384], strides = [1, 1]} : vector<24x456xf32> to vector<24x384xf32>
    %77 = vector.extract_strided_slice %68 {offsets = [0, 50], sizes = [24, 384], strides = [1, 1]} : vector<24x456xf32> to vector<24x384xf32>
    %78 = tpu.concatenate %69, %70, %71, %72, %73, %74, %75, %76, %77 in 0 : vector<24x384xf32>, vector<24x384xf32>, vector<24x384xf32>, vector<24x384xf32>, vector<24x384xf32>, vector<24x384xf32>, vector<24x384xf32>, vector<24x384xf32>, vector<24x384xf32> -> vector<216x384xf32>
    %c0_28 = arith.constant 0 : index
    %c0_29 = arith.constant 0 : index
    %79 = vector.load %arg8[%c0_28, %c0_29] : memref<8x216xbf16, #tpu.memory_space<vmem>>, vector<8x216xbf16>
    %80 = arith.truncf %78 : vector<216x384xf32> to vector<216x384xbf16>
    %cst_30 = arith.constant dense<0.000000e+00> : vector<8x384xf32>
    %81 = tpu.matmul %79, %80, %cst_30 {dimension_numbers = #tpu.dot_dimension_numbers<[1], [0], [0], [1], [0, 0, 1, 1], [], []>} : vector<8x216xbf16>, vector<216x384xbf16>, vector<8x384xf32> -> vector<8x384xf32>
    %c0_31 = arith.constant 0 : index
    %c0_32 = arith.constant 0 : index
    %82 = vector.load %arg9[%c0_31, %c0_32] : memref<8x3xf32, #tpu.memory_space<vmem>>, vector<8x1xf32>
    %c0_33 = arith.constant 0 : index
    %c1_34 = arith.constant 1 : index
    %83 = vector.load %arg9[%c0_33, %c1_34] : memref<8x3xf32, #tpu.memory_space<vmem>>, vector<8x1xf32>
    %c0_35 = arith.constant 0 : index
    %c2_36 = arith.constant 2 : index
    %84 = vector.load %arg9[%c0_35, %c2_36] : memref<8x3xf32, #tpu.memory_space<vmem>>, vector<8x1xf32>
    %85 = vector.broadcast %82 : vector<8x1xf32> to vector<8x384xf32>
    %86 = arith.addf %81, %85 : vector<8x384xf32>
    %cst_37 = arith.constant 0.000000e+00 : f32
    %87 = vector.broadcast %cst_37 : f32 to vector<8x384xf32>
    %88 = arith.cmpf ogt, %86, %87 : vector<8x384xf32>
    %cst_38 = arith.constant 0.000000e+00 : f32
    %89 = vector.broadcast %cst_38 : f32 to vector<8x384xf32>
    %90 = arith.minimumf %86, %89 : vector<8x384xf32>
    %91 = math.exp %90 : vector<8x384xf32>
    %cst_39 = arith.constant 1.000000e+00 : f32
    %92 = vector.broadcast %cst_39 : f32 to vector<8x384xf32>
    %93 = arith.subf %91, %92 : vector<8x384xf32>
    %94 = arith.select %88, %86, %93 : vector<8x384xi1>, vector<8x384xf32>
    %c0_40 = arith.constant 0 : index
    %c0_41 = arith.constant 0 : index
    %95 = vector.load %arg10[%c0_40, %c0_41] : memref<1x384xf32, #tpu.memory_space<vmem>>, vector<1x384xf32>
    %cst_42 = arith.constant 5.000000e-01 : f32
    %96 = vector.broadcast %cst_42 : f32 to vector<1x384xf32>
    %97 = arith.cmpf ogt, %95, %96 : vector<1x384xf32>
    %cst_43 = arith.constant 0.000000e+00 : f32
    %98 = vector.shape_cast %97 : vector<1x384xi1> to vector<1x384xi1>
    %99 = vector.broadcast %98 : vector<1x384xi1> to vector<8x384xi1>
    %100 = vector.broadcast %cst_43 : f32 to vector<8x384xf32>
    %101 = arith.select %99, %94, %100 : vector<8x384xi1>, vector<8x384xf32>
    %cst_44 = arith.constant dense<0.000000e+00> : vector<8xf32>
    %102 = vector.multi_reduction <add>, %101, %cst_44 [1] : vector<8x384xf32> to vector<8xf32>
    %103 = vector.shape_cast %102 : vector<8xf32> to vector<8x1xf32>
    %104 = arith.mulf %101, %101 : vector<8x384xf32>
    %cst_45 = arith.constant dense<0.000000e+00> : vector<8xf32>
    %105 = vector.multi_reduction <add>, %104, %cst_45 [1] : vector<8x384xf32> to vector<8xf32>
    %106 = vector.shape_cast %105 : vector<8xf32> to vector<8x1xf32>
    %c0_46 = arith.constant 0 : index
    %c0_47 = arith.constant 0 : index
    %107 = vector.load %arg11[%c0_46, %c0_47] : memref<8x8xf32, #tpu.memory_space<vmem>>, vector<8x8xf32>
    %108 = tpu.concatenate %103, %106 in 1 : vector<8x1xf32>, vector<8x1xf32> -> vector<8x2xf32>
    %cst_48 = arith.constant dense<0.000000e+00> : vector<8x2xf32>
    %109 = tpu.matmul %107, %108, %cst_48 {dimension_numbers = #tpu.dot_dimension_numbers<[1], [0], [0], [1], [0, 0, 1, 1], [], []>} : vector<8x8xf32>, vector<8x2xf32>, vector<8x2xf32> -> vector<8x2xf32>
    %cst_49 = arith.constant 3.906250e-03 : f32
    %110 = vector.broadcast %cst_49 : f32 to vector<8x2xf32>
    %111 = arith.mulf %109, %110 : vector<8x2xf32>
    %112 = vector.extract_strided_slice %111 {offsets = [0, 0], sizes = [8, 1], strides = [1, 1]} : vector<8x2xf32> to vector<8x1xf32>
    %113 = vector.extract_strided_slice %111 {offsets = [0, 1], sizes = [8, 1], strides = [1, 1]} : vector<8x2xf32> to vector<8x1xf32>
    %114 = arith.mulf %112, %112 : vector<8x1xf32>
    %115 = arith.subf %113, %114 : vector<8x1xf32>
    %cst_50 = arith.constant 9.99999974E-6 : f32
    %116 = vector.broadcast %cst_50 : f32 to vector<8x1xf32>
    %117 = arith.addf %115, %116 : vector<8x1xf32>
    %118 = math.rsqrt %117 : vector<8x1xf32>
    %119 = arith.mulf %118, %83 : vector<8x1xf32>
    %120 = arith.mulf %112, %119 : vector<8x1xf32>
    %121 = arith.subf %84, %120 : vector<8x1xf32>
    %122 = vector.broadcast %119 : vector<8x1xf32> to vector<8x384xf32>
    %123 = arith.mulf %94, %122 : vector<8x384xf32>
    %124 = vector.broadcast %121 : vector<8x1xf32> to vector<8x384xf32>
    %125 = arith.addf %123, %124 : vector<8x384xf32>
    %c0_51 = arith.constant 0 : index
    %c0_52 = arith.constant 0 : index
    %c0_53 = arith.constant 0 : index
    %126 = vector.load %arg12[%c0_51, %c0_52, %c0_53] : memref<1x8x384xf32, #tpu.memory_space<vmem>>, vector<1x8x384xf32>
    %127 = vector.shape_cast %126 : vector<1x8x384xf32> to vector<8x384xf32>
    %128 = vector.shape_cast %125 : vector<8x384xf32> to vector<1x8x384xf32>
    tpu.vector_store %arg12[%c0_51, %c0_52, %c0_53], %128 {strides = array<i32>} : memref<1x8x384xf32, #tpu.memory_space<vmem>>, vector<1x8x384xf32>,
    return
  }
  func.func @transform_0(%arg0: i32) -> (i32, i32, i32) {
    %c0_i32 = arith.constant 0 : i32
    %c0_i32_0 = arith.constant 0 : i32
    %c0_i32_1 = arith.constant 0 : i32
    return %arg0, %c0_i32, %c0_i32_0 : i32, i32, i32
  }
  func.func @transform_1(%arg0: i32) -> (i32, i32, i32) {
    %c0_i32 = arith.constant 0 : i32
    %c0_i32_0 = arith.constant 0 : i32
    %c0_i32_1 = arith.constant 0 : i32
    return %arg0, %c0_i32, %c0_i32_0 : i32, i32, i32
  }
  func.func @transform_2(%arg0: i32) -> (i32, i32) {
    %c0_i32 = arith.constant 0 : i32
    %c0_i32_0 = arith.constant 0 : i32
    %c0_i32_1 = arith.constant 0 : i32
    return %c0_i32, %c0_i32_0 : i32, i32
  }
  func.func @transform_3(%arg0: i32) -> (i32, i32) {
    %c0_i32 = arith.constant 0 : i32
    %c0_i32_0 = arith.constant 0 : i32
    %c0_i32_1 = arith.constant 0 : i32
    return %c0_i32, %c0_i32_0 : i32, i32
  }
  func.func @transform_4(%arg0: i32) -> (i32, i32) {
    %c0_i32 = arith.constant 0 : i32
    %c0_i32_0 = arith.constant 0 : i32
    %c0_i32_1 = arith.constant 0 : i32
    return %c0_i32, %c0_i32_0 : i32, i32
  }
  func.func @transform_5(%arg0: i32) -> (i32, i32) {
    %c0_i32 = arith.constant 0 : i32
    %c0_i32_0 = arith.constant 0 : i32
    %c0_i32_1 = arith.constant 0 : i32
    return %c0_i32, %c0_i32_0 : i32, i32
  }
  func.func @transform_6(%arg0: i32) -> (i32, i32) {
    %c0_i32 = arith.constant 0 : i32
    %c0_i32_0 = arith.constant 0 : i32
    %c0_i32_1 = arith.constant 0 : i32
    return %c0_i32, %c0_i32_0 : i32, i32
  }
  func.func @transform_7(%arg0: i32) -> (i32, i32) {
    %c0_i32 = arith.constant 0 : i32
    %c0_i32_0 = arith.constant 0 : i32
    %c0_i32_1 = arith.constant 0 : i32
    return %c0_i32, %c0_i32_0 : i32, i32
  }
  func.func @transform_8(%arg0: i32) -> (i32, i32) {
    %c0_i32 = arith.constant 0 : i32
    %c0_i32_0 = arith.constant 0 : i32
    %c0_i32_1 = arith.constant 0 : i32
    return %c0_i32, %c0_i32_0 : i32, i32
  }
  func.func @transform_9(%arg0: i32) -> (i32, i32) {
    %c0_i32 = arith.constant 0 : i32
    %c0_i32_0 = arith.constant 0 : i32
    %c0_i32_1 = arith.constant 0 : i32
    return %c0_i32, %c0_i32_0 : i32, i32
  }
  func.func @transform_10(%arg0: i32) -> (i32, i32) {
    %c0_i32 = arith.constant 0 : i32
    %c0_i32_0 = arith.constant 0 : i32
    %c0_i32_1 = arith.constant 0 : i32
    return %c0_i32, %c0_i32_0 : i32, i32
  }
  func.func @transform_11(%arg0: i32) -> (i32, i32, i32) {
    %c0_i32 = arith.constant 0 : i32
    %c0_i32_0 = arith.constant 0 : i32
    %c0_i32_1 = arith.constant 0 : i32
    return %arg0, %c0_i32, %c0_i32_0 : i32, i32, i32
  }
}

</mosaic_0001>

<bundles_post_ra>
// kernel: upblock_forward.1
= control target key start
LH: loop header
LB: loop body
LE: loop exit
PB: predicated region body
PF: predicated region fallthrough
CT: control target
= control target key end

     0   :  { %s3493_s17 = smov 0   ;;  %s4460_s0 = inlined_call_operand.vmem [shape: bf16[2,4,160], index: 0, kind: input, shape index: {}]   ;;  %s4461_s1 = inlined_call_operand.vmem [shape: f32[2,8,456], index: 1, kind: input, shape index: {}]   ;;  %s4462_s2 = inlined_call_operand.vmem [shape: bf16[144,4], index: 2, kind: input, shape index: {}]   ;;  %s4463_s3 = inlined_call_operand.vmem [shape: f32[16,3], index: 3, kind: input, shape index: {}]   ;;  %s4464_s4 = inlined_call_operand.vmem [shape: f32[1,512], index: 4, kind: input, shape index: {}]   ;;  %s4465_s5 = inlined_call_operand.vmem [shape: f32[16,16], index: 5, kind: input, shape index: {}]   ;;  %s4466_s6 = inlined_call_operand.vmem [shape: bf16[512,456], index: 6, kind: input, shape index: {}]   ;;  %s4467_s7 = inlined_call_operand.vmem [shape: bf16[8,216], index: 7, kind: input, shape index: {}]   ;;  %s4468_s8 = inlined_call_operand.vmem [shape: f32[8,3], index: 8, kind: input, shape index: {}]   ;;  %s4469_s9 = inlined_call_operand.vmem [shape: f32[1,384], index: 9, kind: input, shape index: {}]   ;;  %s4470_s10 = inlined_call_operand.vmem [shape: f32[8,8], index: 10, kind: input, shape index: {}]   ;;  %s4471_s11 = inlined_call_operand.vmem [shape: f32[2,8,384], index: 11, kind: output, shape index: {}]  }
   0x1 LB: > { %s2696_s18 = sadd.s32 4294967295, %s3414_s17   ;;  %p2700_p0 = scmp.ge.s32.totalorder %s3414_s17, 1  ;;  %s3414_s17 = sphi %s3493_s17, %s21_s17  }
   0x2   : > { %p347_p1 = scmp.lt.s32.totalorder %s3414_s17, 3 }
   0x4   : > { %p348_p2 = pnand %p2700_p0, %p347_p1 }
   0x5   : > { %p392_p3 = scmp.lt.s32.totalorder (!%p348_p2), %s2696_s18, 1  ;;  %v3416_v0 = vmov (!%p348_p2), 0   ;;  %vm509_vm0 = vcmask (!%p348_p2), 1041408   ;;  %v3175_v4 = vld [vmem:[%s4462_s2] sm:$0xff] (!%p348_p2)   ;;  %vm481_vm1 = vcmask (!%p348_p2), 31744   ;;  %v3520_v6 = vld [vmem:[%s4463_s3 + $0x8] sm:$0xff] (!%p348_p2) }
   0x6   : > { %351 = sbr.rel (%p348_p2) target bundleno = 2901 (0xb55), region = 64  ;;  %548 = vmatprep.mubr.bf16.mxu0 (!%p348_p2), %v3416_v0  ;;  %2933 = vset.pattern.permute.xlu0 (!%p348_p2), %v3416_v0  ;;  %v3515_v5 = vld [vmem:[%s4463_s3] sm:$0xff] (!%p348_p2)  ;;  %v3176_v7 = vld [vmem:[%s4462_s2 + $0x8] sm:$0xff] (!%p348_p2)   ;;  %v3177_v8 = vld [vmem:[%s4462_s2 + $0x10] sm:$0xff] (!%p348_p2)   ;;  %s3417_s28 = smov (!%p348_p2), 127   ;;  %vm643_vm2 = vcmask (!%p348_p2), 1039360  }
   0x7   : > { %728 = vperm.xlu0 (!%p348_p2), %2933, %v3515_v5   ;;  %v3178_v9 = vld [vmem:[%s4462_s2 + $0x18] sm:$0xff] (!%p348_p2)   ;;  %v3179_v10 = vld [vmem:[%s4462_s2 + $0x20] sm:$0xff] (!%p348_p2)   ;;  %v3180_v11 = vld [vmem:[%s4462_s2 + $0x28] sm:$0xff] (!%p348_p2)   ;;  %s3418_s29 = smov (!%p348_p2), 112   ;;  %s3419_s30 = smov (!%p348_p2), 111   ;;  %vm662_vm3 = vcmask (!%p348_p2), 916480  }
   0x8   : > { %v3181_v12 = vld [vmem:[%s4462_s2 + $0x30] sm:$0xff] (!%p348_p2)   ;;  %v3182_v13 = vld [vmem:[%s4462_s2 + $0x38] sm:$0xff] (!%p348_p2)   ;;  %v3183_v14 = vld [vmem:[%s4462_s2 + $0x40] sm:$0xff] (!%p348_p2)   ;;  %vm717_vm4 = vcmask (!%p348_p2), 908288   ;;  %s3420_s20 = smov (!%p348_p2), 1   ;;  %s3422_s21 = smov (!%p348_p2), 2  }
   0x9   : > { %s3425_s23 = smov (!%p348_p2), 104   ;;  %s3426_s24 = smov (!%p348_p2), 103  }
   0xa   : > { %s3427_s25 = smov (!%p348_p2), 102   ;;  %s3428_s12 = smov (!%p348_p2), 80  }
   0xb   : > { %733 = vperm.xlu0 (!%p348_p2), %2933, %v3520_v6   ;;  %s3429_s13 = smov (!%p348_p2), 79  }
   0xd   : > { %s4473_s18 = smov (!%p392_p3, %s2696_s18), 1 }
   0xe   : > { %s2875_s19 = sshll.u32 %s4473_s18, 2  ;;  %s2876_s14 = sshll.u32 %s4473_s18, 5 }
   0xf   : > { %s396_s22 = scalar_lea.vmem %s4460_s0, %s2875_s19  ;;  %s401_s19 = scalar_lea.vmem %s4461_s1, %s2876_s14 }
  0x10   : > { %v2715_v1 = vld.sshfl [vmem:[%s396_s22] sm:$0x33 pattern:$0x76325410]  ;;  %s3424_s22 = smov 126  }
  0x11   : > { %v480_v2 = vcombine.high %v2715_v1, %v2715_v1  ;;  %v511_v3 = vsel %vm509_vm0, %v2715_v1, 0 }
  0x13   : > { %2716 = vmatprep.subr.msk.bf16.mxu0 %vm509_vm0, %v480_v2 }
  0x14   : > { %517 = vmatpush1.bf16.msra.mxu0 %v511_v3 }
  0x17   : > { %2717 = vmatmul.mubr.msk.bf16.vlgmr.msra.gmra.mrb[0].mxu0 %vm481_vm1, %v3175_v4 }
  0x18   : > { %556 = vmatprep.mubr.bf16.mxu0 %v3416_v0 }
  0x1f   : > { %2718 = vmatmul.mubr.msk.bf16.gmra.mrb[4].mxu0 %vm481_vm1, %v3176_v7 }
  0x20   : > { %564 = vmatprep.mubr.bf16.mxu0 %v3416_v0 }
  0x27   : > { %2719 = vmatmul.mubr.msk.bf16.gmra.mrb[8].mxu0 %vm481_vm1, %v3177_v8 }
  0x28   : > { %574 = vmatprep.mubr.bf16.mxu0 %v3416_v0 }
  0x2f   : > { %2720 = vmatmul.mubr.msk.bf16.gmra.mrb[12].mxu0 %vm481_vm1, %v3178_v9 }
  0x30   : > { %582 = vmatprep.mubr.bf16.mxu0 %v3416_v0 }
  0x37   : > { %2721 = vmatmul.mubr.msk.bf16.gmra.mrb[16].mxu0 %vm481_vm1, %v3179_v10 }
  0x38   : > { %592 = vmatprep.mubr.bf16.mxu0 %v3416_v0 }
  0x3f   : > { %2722 = vmatmul.mubr.msk.bf16.gmra.mrb[20].mxu0 %vm481_vm1, %v3180_v11 }
  0x40   : > { %600 = vmatprep.mubr.bf16.mxu0 %v3416_v0 }
  0x47   : > { %2723 = vmatmul.mubr.msk.bf16.gmra.mrb[24].mxu0 %vm481_vm1, %v3181_v12 }
  0x48   : > { %610 = vmatprep.mubr.bf16.mxu0 %v3416_v0 }
  0x4f   : > { %2724 = vmatmul.mubr.msk.bf16.gmra.mrb[28].mxu0 %vm481_vm1, %v3182_v13 }
  0x50   : > { %620 = vmatprep.mubr.bf16.mxu0 %v3416_v0 }
  0x57   : > { %2725 = vmatmul.mubr.msk.bf16.gmra.mrb[32].mxu0 %vm481_vm1, %v3183_v14 }
  0x86   : > { %v3587_v52 = vpop.permute.xlu0 %728 }
  0x8a   : > { %v3589_v54 = vpop.permute.xlu0 %733 }
  0xea   : > { %v3565_v15 = vpop.f32.mrb[0].mxu0 }
  0xeb   : > { %v552_v16 = vpop.f32.mrb[1].mxu0  ;;  %v3602_v10 = vadd.f32 %v3587_v52, %v3565_v15 }
  0xec   : > { %v3567_v17 = vpop.f32.mrb[2].mxu0 }
  0xed   : > { %v555_v18 = vpop.f32.mrb[3].mxu0  ;;  %vm744_vm8 = vcmp.gt.f32.partialorder %v3602_v10, 0.0 }
  0xf2   : > { %v3569_v19 = vpop.f32.mrb[4].mxu0 }
  0xf3   : > { %v560_v20 = vpop.f32.mrb[5].mxu0 }
  0xf4   : > { %v3571_v21 = vpop.f32.mrb[6].mxu0  ;;  %v752_v20 = vmin.f32 %v3602_v10, 0.0 }
  0xf5   : > { %v563_v22 = vpop.f32.mrb[7].mxu0 }
  0xfa   : > { %v566_v23 = vpop.f32.mrb[8].mxu0 }
  0xfb   : > { %635 = vrot.lane.b32.xlu1 %v566_v23, %s3417_s28  ;;  %v568_v24 = vpop.f32.mrb[9].mxu0 }
  0xfc   : > { %v570_v25 = vpop.f32.mrb[10].mxu0 }
  0xfd   : > { %639 = vrot.lane.b32.xlu0 %v570_v25, %s3417_s28  ;;  %v572_v26 = vpop.f32.mrb[11].mxu0 }
  0xff   : > { %637 = vrot.lane.b32.xlu1 %v568_v24, %s3417_s28 }
 0x102   : > { %v576_v27 = vpop.f32.mrb[12].mxu0 }
 0x103   : > { %641 = vrot.lane.b32.xlu1 %v572_v26, %s3417_s28  ;;  %v578_v28 = vpop.f32.mrb[13].mxu0 }
 0x104   : > { %v3577_v29 = vpop.f32.mrb[14].mxu0 }
 0x105   : > { %v581_v30 = vpop.f32.mrb[15].mxu0 }
 0x10a   : > { %v584_v31 = vpop.f32.mrb[16].mxu0 }
 0x10b   : > { %654 = vrot.lane.b32.xlu0 %v584_v31, %s3418_s29  ;;  %v586_v32 = vpop.f32.mrb[17].mxu0 }
 0x10c   : > { %656 = vrot.lane.b32.xlu1 %v586_v32, %s3418_s29  ;;  %v588_v33 = vpop.f32.mrb[18].mxu0 }
 0x10d   : > { %v590_v34 = vpop.f32.mrb[19].mxu0 }
 0x10f   : > { %658 = vrot.lane.b32.xlu0 %v588_v33, %s3418_s29 }
 0x110   : > { %660 = vrot.lane.b32.xlu1 %v590_v34, %s3418_s29 }
 0x112   : > { %v3579_v35 = vpop.f32.mrb[20].mxu0 }
 0x113   : > { %v596_v36 = vpop.f32.mrb[21].mxu0 }
 0x114   : > { %v3581_v37 = vpop.f32.mrb[22].mxu0 }
 0x115   : > { %v599_v38 = vpop.f32.mrb[23].mxu0 }
 0x116   : > { %v795_v38 = vlaneseq }
 0x11a   : > { %v602_v39 = vpop.f32.mrb[24].mxu0 }
 0x11b   : > { %673 = vrot.lane.b32.xlu0 %v602_v39, %s3417_s28  ;;  %v604_v40 = vpop.f32.mrb[25].mxu0 }
 0x11c   : > { %675 = vrot.lane.b32.xlu1 %v604_v40, %s3417_s28  ;;  %v606_v41 = vpop.f32.mrb[26].mxu0 }
 0x11d   : > { %v608_v42 = vpop.f32.mrb[27].mxu0 }
 0x11f   : > { %677 = vrot.lane.b32.xlu0 %v606_v41, %s3417_s28 }
 0x120   : > { %679 = vrot.lane.b32.xlu1 %v608_v42, %s3417_s28 }
 0x122   : > { %v612_v43 = vpop.f32.mrb[28].mxu0 }
 0x123   : > { %691 = vrot.lane.b32.xlu0 %v612_v43, %s3418_s29  ;;  %v614_v44 = vpop.f32.mrb[29].mxu0 }
 0x124   : > { %693 = vrot.lane.b32.xlu1 %v614_v44, %s3418_s29  ;;  %v616_v45 = vpop.f32.mrb[30].mxu0 }
 0x125   : > { %v618_v46 = vpop.f32.mrb[31].mxu0 }
 0x127   : > { %695 = vrot.lane.b32.xlu0 %v616_v45, %s3418_s29 }
 0x128   : > { %697 = vrot.lane.b32.xlu1 %v618_v46, %s3418_s29  ;;  %v792_v46 = vld [vmem:[%s4464_s4] sm:$0xf] }
 0x129   : > { %vm793_vm5 = vcmp.gt.f32.partialorder %v792_v46, 0.5 }
 0x12a   : > { %v622_v47 = vpop.f32.mrb[32].mxu0 }
 0x12b   : > { %709 = vrot.lane.b32.xlu0 %v622_v47, %s3419_s30  ;;  %v624_v48 = vpop.f32.mrb[33].mxu0 }
 0x12c   : > { %711 = vrot.lane.b32.xlu1 %v624_v48, %s3419_s30  ;;  %v626_v49 = vpop.f32.mrb[34].mxu0  ;;  %v3634_v48 = vshrl.u32 %v795_v38, 7 }
 0x12d   : > { %v628_v50 = vpop.f32.mrb[35].mxu0 }
 0x12f   : > { %713 = vrot.lane.b32.xlu0 %v626_v49, %s3419_s30 }
 0x130   : > { %715 = vrot.lane.b32.xlu1 %v628_v50, %s3419_s30 }
 0x16d   : > { %v636_v51 = vpop.permute.xlu1 %635 }
 0x16f   : > { %v640_v55 = vpop.permute.xlu0 %639 }
 0x171   : > { %v638_v53 = vpop.permute.xlu1 %637 }
 0x172   : > { %v644_v59 = vsel %vm643_vm2, %v636_v51, %v638_v53 }
 0x173   : > { %v648_v62 = vadd.f32 %v644_v59, %v3569_v19  ;;  %v3614_v19 = vadd.f32 %v3589_v54, %v3567_v17 }
 0x175   : > { %v642_v56 = vpop.permute.xlu1 %641  ;;  %v3596_v7 = vadd.f32 %v3587_v52, %v648_v62  ;;  %v756_v26 = vmin.f32 %v3614_v19, 0.0  ;;  %vm748_vm13 = vcmp.gt.f32.partialorder %v3614_v19, 0.0 }
 0x176   : > { %v645_v1 = vsel %vm643_vm2, %v640_v55, %v642_v56 }
 0x177   : > { %v649_v8 = vadd.f32 %v645_v1, %v3571_v21  ;;  %v753_v16 = vmin.f32 %v3596_v7, 0.0  ;;  %v768_v34 = vmul.f32 1.442695, %v756_v26  ;;  %vm745_vm6 = vcmp.gt.f32.partialorder %v3596_v7, 0.0 }
 0x179   : > { %v3610_v18 = vadd.f32 %v3589_v54, %v649_v8  ;;  %v762_v24 = vmul.f32 1.442695, %v753_v16  ;;  %v809_v16 = vsub.s32 3, %v3634_v48 }
 0x17b   : > { %v757_v25 = vmin.f32 %v3610_v18, 0.0  ;;  %3378 = vpow2.f32 %v762_v24  ;;  %vm749_vm12 = vcmp.gt.f32.partialorder %v3610_v18, 0.0 }
 0x17d   : > { %v655_v57 = vpop.permute.xlu0 %654  ;;  %v770_v32 = vmul.f32 1.442695, %v757_v25 }
 0x17e   : > { %v657_v58 = vpop.permute.xlu1 %656 }
 0x17f   : > { %v663_v63 = vsel %vm662_vm3, %v655_v57, %v657_v58  ;;  %v801_v58 = vsub.s32 1, %v3634_v48 }
 0x180   : > { %v667_v3 = vadd.f32 %v663_v63, %v576_v27  ;;  %v760_v27 = vmul.f32 1.442695, %v752_v20  ;;  %v805_v63 = vsub.s32 2, %v3634_v48 }
 0x181   : > { %v659_v60 = vpop.permute.xlu0 %658 }
 0x182   : > { %v661_v61 = vpop.permute.xlu1 %660  ;;  %v3605_v12 = vadd.f32 %v3587_v52, %v667_v3  ;;  %3380 = vpow2.f32 %v760_v27 }
 0x183   : > { %v664_v9 = vsel %vm662_vm3, %v659_v60, %v661_v61  ;;  %v797_v60 = vsub.s32 0, %v3634_v48 }
 0x184   : > { %v668_v13 = vadd.f32 %v664_v9, %v3577_v29  ;;  %v754_v21 = vmin.f32 %v3605_v12, 0.0  ;;  %vm746_vm10 = vcmp.gt.f32.partialorder %v3605_v12, 0.0 }
 0x185   : > { %v3379_v59 = vpop.eup %3378 }
 0x186   : > { %v3619_v22 = vadd.f32 %v3589_v54, %v668_v13  ;;  %v764_v17 = vmul.f32 1.442695, %v754_v21  ;;  %v2727_v3 = vadd.f32 -1.0, %v3379_v59 }
 0x188   : > { %v758_v30 = vmin.f32 %v3619_v22, 0.0  ;;  %3382 = vpow2.f32 %v764_v17  ;;  %v3655_v21 = vsel %vm745_vm6, %v3596_v7, %v2727_v3  ;;  %vm750_vm15 = vcmp.gt.f32.partialorder %v3619_v22, 0.0 }
 0x189   : > { %3384 = vpow2.f32 %v770_v32  ;;  %vm2038_vm6 = vcmask 1031168  }
 0x18a   : > { %v772_v41 = vmul.f32 1.442695, %v758_v30  ;;  %3386 = vpow2.f32 %v768_v34 }
 0x18c   : > { %3388 = vpow2.f32 %v772_v41 }
 0x18d   : > { %v674_v2 = vpop.permute.xlu0 %673 }
 0x18e   : > { %v676_v4 = vpop.permute.xlu1 %675 }
 0x18f   : > { %v681_v28 = vsel %vm643_vm2, %v674_v2, %v676_v4 }
 0x190   : > { %v685_v36 = vadd.f32 %v681_v28, %v3579_v35 }
 0x191   : > { %v678_v11 = vpop.permute.xlu0 %677 }
 0x192   : > { %v680_v14 = vpop.permute.xlu1 %679 }
 0x193   : > { %v682_v39 = vsel %vm643_vm2, %v678_v11, %v680_v14 }
 0x194   : > { %v686_v35 = vadd.f32 %v682_v39, %v3581_v37  ;;  %v794_v37 = vsel %vm793_vm5, 1, %v3416_v0  ;;  %vm2370_vm5 = vcmask 719872  }
 0x195   : > { %v692_v15 = vpop.permute.xlu0 %691  ;;  %v802_v4 = vrot.slane %v794_v37, %v801_v58  ;;  %v798_v9 = vrot.slane %v794_v37, %v797_v60  ;;  %v810_v26 = vrot.slane %v794_v37, %v809_v16 }
 0x196   : > { %v694_v23 = vpop.permute.xlu1 %693 }
 0x197   : > { %v699_v33 = vsel %vm662_vm3, %v692_v15, %v694_v23  ;;  %vm812_vm7 = vcmp.eq.s32.totalorder %v802_v4, 1  ;;  %vm811_vm9 = vcmp.eq.s32.totalorder %v798_v9, 1  ;;  %vm814_vm14 = vcmp.eq.s32.totalorder %v810_v26, 1 }
 0x198   : > { %v703_v42 = vadd.f32 %v699_v33, %v685_v36  ;;  %v816_v7 = vsel %vm812_vm7, %v3655_v21, 0.0 }
 0x199   : > { %v696_v29 = vpop.permute.xlu0 %695 }
 0x19a   : > { %v698_v31 = vpop.permute.xlu1 %697 }
 0x19b   : > { %v700_v44 = vsel %vm662_vm3, %v696_v29, %v698_v31  ;;  %v834_v31 = vmul.f32 %v816_v7, %v816_v7  ;;  %vm856_vm3 = vcmask 130048  }
 0x19c   : > { %v704_v50 = vadd.f32 %v700_v44, %v686_v35 }
 0x19d   : > { %v710_v40 = vpop.permute.xlu0 %709 }
 0x19e   : > { %v712_v43 = vpop.permute.xlu1 %711 }
 0x19f   : > { %v718_v45 = vsel %vm717_vm4, %v710_v40, %v712_v43 }
 0x1a0   : > { %v722_v47 = vadd.f32 %v718_v45, %v703_v42 }
 0x1a1   : > { %v714_v49 = vpop.permute.xlu0 %713 }
 0x1a2   : > { %v739_v51 = vadd.f32 %v3587_v52, %v722_v47  ;;  %v716_v53 = vpop.permute.xlu1 %715  ;;  %v3381_v52 = vpop.eup %3380 }
 0x1a3   : > { %v719_v55 = vsel %vm717_vm4, %v714_v49, %v716_v53  ;;  %v3383_v1 = vpop.eup %3382  ;;  %v2726_v13 = vadd.f32 -1.0, %v3381_v52  ;;  %vm853_vm4 = vcmask 7168  }
 0x1a4   : > { %v755_v56 = vmin.f32 %v739_v51, 0.0  ;;  %v723_v57 = vadd.f32 %v719_v55, %v704_v50  ;;  %v3385_v8 = vpop.eup %3384  ;;  %v2728_v20 = vadd.f32 -1.0, %v3383_v1  ;;  %vm747_vm0 = vcmp.gt.f32.partialorder %v739_v51, 0.0 }
 0x1a5   : > { %v3387_v11 = vpop.eup %3386  ;;  %v2731_v23 = vadd.f32 -1.0, %v3385_v8  ;;  %v3659_v25 = vsel %vm744_vm8, %v3602_v10, %v2726_v13  ;;  %vm2167_vm8 = vcmask 834560  }
 0x1a6   : > { %v766_v61 = vmul.f32 1.442695, %v755_v56  ;;  %v3642_v62 = vadd.f32 %v3589_v54, %v723_v57  ;;  %v806_v54 = vrot.slane %v794_v37, %v805_v63  ;;  %v3389_v15 = vpop.eup %3388  ;;  %v2730_v24 = vadd.f32 -1.0, %v3387_v11 }
 0x1a7   : > { %v3664_v27 = vsel %vm746_vm10, %v3605_v12, %v2728_v20  ;;  %v2732_v28 = vadd.f32 -1.0, %v3389_v15  ;;  %v3670_v29 = vsel %vm749_vm12, %v3610_v18, %v2731_v23  ;;  %v815_v10 = vsel %vm811_vm9, %v3659_v25, 0.0 }
 0x1a8   : > { %3390 = vpow2.f32 %v766_v61  ;;  %v759_v2 = vmin.f32 %v3642_v62, 0.0  ;;  %vm813_vm11 = vcmp.eq.s32.totalorder %v806_v54, 1  ;;  %v3675_v17 = vsel %vm748_vm13, %v3614_v19, %v2730_v24 }
 0x1a9   : > { %v817_v12 = vsel %vm813_vm11, %v3664_v27, 0.0  ;;  %v823_v33 = vadd.f32 %v816_v7, %v815_v10  ;;  %v3681_v34 = vsel %vm750_vm15, %v3619_v22, %v2732_v28  ;;  %v820_v18 = vsel %vm812_vm7, %v3670_v29, 0.0 }
 0x1aa   : > { %v774_v14 = vmul.f32 1.442695, %v759_v2  ;;  %v833_v36 = vmul.f32 %v815_v10, %v815_v10  ;;  %v819_v19 = vsel %vm811_vm9, %v3675_v17, 0.0  ;;  %v835_v40 = vmul.f32 %v817_v12, %v817_v12  ;;  %v851_v2 = vld [vmem:[%s4465_s5] sm:$0xff] }
 0x1ab   : > { %v824_v39 = vadd.f32 %v823_v33, %v817_v12  ;;  %v821_v22 = vsel %vm813_vm11, %v3681_v34, 0.0  ;;  %v828_v44 = vadd.f32 %v820_v18, %v819_v19  ;;  %v838_v47 = vmul.f32 %v820_v18, %v820_v18  ;;  %2887 = vmatprep.mubr.msk.f32.mxu1 %vm856_vm3, %v851_v2  ;;  %v3216_v2 = vld [vmem:[%s4466_s6 + $0xa4] ss:$16 sps:$4 sm:$0xff]  }
 0x1ac   : > { %3392 = vpow2.f32 %v774_v14  ;;  %v841_v43 = vadd.f32 %v834_v31, %v833_v36  ;;  %v837_v49 = vmul.f32 %v819_v19, %v819_v19  ;;  %vm751_vm1 = vcmp.gt.f32.partialorder %v3642_v62, 0.0  ;;  %v852_v14 = vld [vmem:[%s4465_s5 + $0x8] sm:$0xff] }
 0x1ad   : > { %v829_v53 = vadd.f32 %v828_v44, %v821_v22  ;;  %v839_v55 = vmul.f32 %v821_v22, %v821_v22  ;;  %v3421_v31 = vmov 1   ;;  %v3189_v22 = vld [vmem:[%s4466_s6 + $0xc] ss:$16 sps:$4 sm:$0xff]   ;;  %v3192_v44 = vld [vmem:[%s4466_s6 + $0x24] ss:$16 sps:$4 sm:$0xff]   ;;  %vm2081_vm7 = vcmask 850944  }
 0x1ae   : > { %v842_v50 = vadd.f32 %v841_v43, %v835_v40  ;;  %v846_v61 = vadd.f32 %v838_v47, %v837_v49  ;;  %2934 = vset.pattern.permute.xlu0 %v3421_v31  ;;  %2935 = vset.pattern.permute.xlu1 %v3421_v31  ;;  %v3187_v43 = vld [vmem:[%s4466_s6 + $0x8] ss:$16 sps:$4 sm:$0xff]   ;;  %v3198_v47 = vld [vmem:[%s4466_s6 + $0x44] ss:$16 sps:$4 sm:$0xff]   ;;  %v3201_v49 = vld [vmem:[%s4466_s6 + $0x4c] ss:$16 sps:$4 sm:$0xff]  }
 0x1af   : > { %1870 = vmatprep.subr.bf16.mxu0 %v3189_v22  ;;  %v3267_v22 = vld [vmem:[%s4466_s6 + $0x1ac] ss:$16 sps:$4 sm:$0xff]   ;;  %vm2210_vm9 = vcmask 654336   ;;  %vm2253_vm10 = vcmask 646144   ;;  %vm2296_vm11 = vcmask 637952   ;;  %vm2374_vm12 = vcmask 1043456  }
 0x1b0   : > { %v847_v52 = vadd.f32 %v846_v61, %v839_v55  ;;  %1871 = vmatpush1.bf16.msra.mxu0 %v3187_v43  ;;  %v3204_v55 = vld [vmem:[%s4466_s6 + $0x64] ss:$16 sps:$4 sm:$0xff]   ;;  %v3213_v61 = vld [vmem:[%s4466_s6 + $0x8c] ss:$16 sps:$4 sm:$0xff]  }
 0x1b1   : > { %v3264_v43 = vld [vmem:[%s4466_s6 + $0x1a4] ss:$16 sps:$4 sm:$0xff]  }
 0x1b2   : > { %v3391_v30 = vpop.eup %3390 }
 0x1b3   : > { %v2729_v32 = vadd.f32 -1.0, %v3391_v30 }
 0x1b5   : > { %v3687_v38 = vsel %vm747_vm0, %v739_v51, %v2729_v32 }
 0x1b6   : > { %v3393_v41 = vpop.eup %3392  ;;  %v818_v42 = vsel %vm814_vm14, %v3687_v38, 0.0 }
 0x1b7   : > { %v825_v45 = vadd.f32 %v824_v39, %v818_v42  ;;  %v836_v46 = vmul.f32 %v818_v42, %v818_v42  ;;  %v2733_v35 = vadd.f32 -1.0, %v3393_v41  ;;  %v3423_v42 = vmov 2  }
 0x1b9   : > { %826 = vadd.xlane.f32.xlu0 %v825_v45  ;;  %v3695_v51 = vsel %vm751_vm1, %v3642_v62, %v2733_v35  ;;  %v843_v57 = vadd.f32 %v842_v50, %v836_v46  ;;  %v3195_v45 = vld [vmem:[%s4466_s6 + $0x2c] ss:$16 sps:$4 sm:$0xff]   ;;  %v3190_v46 = vld [vmem:[%s4466_s6 + $0x20] ss:$16 sps:$4 sm:$0xff]   ;;  %v3193_v35 = vld [vmem:[%s4466_s6 + $0x28] ss:$16 sps:$4 sm:$0xff]  }
 0x1ba   : > { %v822_v56 = vsel %vm814_vm14, %v3695_v51, 0.0  ;;  %1872 = vmatprep.subr.bf16.mxu0 %v3195_v45  ;;  %v3196_v50 = vld [vmem:[%s4466_s6 + $0x40] ss:$16 sps:$4 sm:$0xff]   ;;  %v3265_v45 = vld [vmem:[%s4466_s6 + $0x1a8] ss:$16 sps:$4 sm:$0xff]  }
 0x1bb   : > { %v830_v59 = vadd.f32 %v829_v53, %v822_v56  ;;  %v840_v37 = vmul.f32 %v822_v56, %v822_v56  ;;  %1873 = vmatpush1.bf16.msra.mxu0 %v3193_v35  ;;  %v3199_v53 = vld [vmem:[%s4466_s6 + $0x48] ss:$16 sps:$4 sm:$0xff]   ;;  %v3207_v56 = vld [vmem:[%s4466_s6 + $0x6c] ss:$16 sps:$4 sm:$0xff]   ;;  %v3406_v35 = vld [vmem:[%s4463_s3] sm:$0xff] }
 0x1bc   : > { %1874 = vmatprep.subr.bf16.mxu0 %v3201_v49  ;;  %v3270_v49 = vld [vmem:[%s4466_s6 + $0x1c4] ss:$16 sps:$4 sm:$0xff]  }
 0x1bd   : > { %844 = vadd.xlane.f32.xlu0 %v843_v57  ;;  %831 = vadd.xlane.f32.xlu1 %v830_v59  ;;  %v848_v1 = vadd.f32 %v847_v52, %v840_v37  ;;  %v3202_v57 = vld [vmem:[%s4466_s6 + $0x60] ss:$16 sps:$4 sm:$0xff]   ;;  %v3205_v59 = vld [vmem:[%s4466_s6 + $0x68] ss:$16 sps:$4 sm:$0xff]   ;;  %v3210_v37 = vld [vmem:[%s4466_s6 + $0x84] ss:$16 sps:$4 sm:$0xff]  }
 0x1be   : > { %v3208_v52 = vld [vmem:[%s4466_s6 + $0x80] ss:$16 sps:$4 sm:$0xff]  }
 0x1bf   : > { %1875 = vmatpush1.bf16.msra.mxu0 %v3199_v53  ;;  %v3268_v53 = vld [vmem:[%s4466_s6 + $0x1c0] ss:$16 sps:$4 sm:$0xff]  }
 0x1c0   : > { %1876 = vmatprep.subr.bf16.mxu0 %v3207_v56 }
 0x1c1   : > { %849 = vadd.xlane.f32.xlu0 %v848_v1  ;;  %v3211_v1 = vld [vmem:[%s4466_s6 + $0x88] ss:$16 sps:$4 sm:$0xff]  }
 0x1c3   : > { %1877 = vmatpush1.bf16.msra.mxu0 %v3205_v59 }
 0x1c4   : > { %1878 = vmatprep.subr.bf16.mxu0 %v3213_v61  ;;  %v3279_v61 = vld [vmem:[%s4466_s6 + $0x1ec] ss:$16 sps:$4 sm:$0xff]  }
 0x1c7   : > { %1879 = vmatpush1.bf16.msra.mxu0 %v3211_v1  ;;  %v3277_v1 = vld [vmem:[%s4466_s6 + $0x1e8] ss:$16 sps:$4 sm:$0xff]  }
 0x246   : > { %v827_v62 = vpop.xlane.xlu0 %826 }
 0x24a   : > { %v845_v3 = vpop.xlane.xlu0 %844  ;;  %v832_v4 = vpop.xlane.xlu1 %831 }
 0x24b   : > { %v854_v9 = vsel %vm853_vm4, %v827_v62, %v845_v3  ;;  %v3219_v62 = vld [vmem:[%s4466_s6 + $0xac] ss:$16 sps:$4 sm:$0xff]   ;;  %v3214_v3 = vld [vmem:[%s4466_s6 + $0xa0] ss:$16 sps:$4 sm:$0xff]  }
 0x24c   : > { %1880 = vmatprep.subr.bf16.mxu0 %v3219_v62  ;;  %v3285_v62 = vld [vmem:[%s4466_s6 + $0x20c] ss:$16 sps:$4 sm:$0xff]  }
 0x24e   : > { %v850_v8 = vpop.xlane.xlu0 %849 }
 0x24f   : > { %v855_v11 = vsel %vm853_vm4, %v832_v4, %v850_v8  ;;  %v3217_v4 = vld [vmem:[%s4466_s6 + $0xa8] ss:$16 sps:$4 sm:$0xff]   ;;  %v3222_v8 = vld [vmem:[%s4466_s6 + $0xc4] ss:$16 sps:$4 sm:$0xff]  }
 0x250   : > { %v2895_v13 = vpack.c.bf16 %v855_v11, %v854_v9  ;;  %v3225_v9 = vld [vmem:[%s4466_s6 + $0xcc] ss:$16 sps:$4 sm:$0xff]   ;;  %v3220_v11 = vld [vmem:[%s4466_s6 + $0xc0] ss:$16 sps:$4 sm:$0xff]   ;;  %1881 = vmatpush1.bf16.msra.mxu0 %v3217_v4 }
 0x251   : > { %1882 = vmatprep.subr.bf16.mxu0 %v3225_v9  ;;  %v3928_v4 = vld [vmem:[%s401_s19 + $0x10] sm:$0xff]  ;;  %v3932_v9 = vld [vmem:[%s401_s19 + $0x18] sm:$0xff] }
 0x252   : > { %2896 = vmatprep.subr.bf16.mxu1 %v2895_v13 }
 0x253   : > { %2898 = vmatpush3.bf16.msra.mxu1 %v2895_v13  ;;  %v3223_v13 = vld [vmem:[%s4466_s6 + $0xc8] ss:$16 sps:$4 sm:$0xff]  }
 0x254   : > { %1883 = vmatpush1.bf16.msra.mxu0 %v3223_v13 }
 0x256   : > { %2888 = vmatmul.mubr.msk.f32.vlgmr.msra.gmra.mrb[0].mxu1 %vm856_vm3, %v852_v14  ;;  %v3228_v14 = vld [vmem:[%s4466_s6 + $0xe4] ss:$16 sps:$4 sm:$0xff]  }
 0x329   : > { %v2889_v54 = vpop.f32.mrb[0].mxu1 }
 0x32a   : > { %v939_v16 = vmul.f32 0.0022222223, %v2889_v54  ;;  %v929_v20 = vpop.f32.mrb[1].mxu1  ;;  %v3231_v54 = vld [vmem:[%s4466_s6 + $0xec] ss:$16 sps:$4 sm:$0xff]  }
 0x32b   : > { %v938_v15 = vmul.f32 0.0022222223, %v929_v20  ;;  %v3229_v20 = vld [vmem:[%s4466_s6 + $0xe8] ss:$16 sps:$4 sm:$0xff]   ;;  %1884 = vmatprep.subr.bf16.mxu0 %v3231_v54 }
 0x32c   : > { %v941_v23 = vmul.f32 %v939_v16, %v939_v16  ;;  %1885 = vmatpush1.bf16.msra.mxu0 %v3229_v20 }
 0x32d   : > { %v940_v24 = vmul.f32 %v938_v15, %v938_v15 }
 0x32e   : > { %946 = vrot.lane.b32.xlu0 %v941_v23, %s3420_s20  ;;  %v3237_v23 = vld [vmem:[%s4466_s6 + $0x10c] ss:$16 sps:$4 sm:$0xff]  }
 0x32f   : > { %944 = vrot.lane.b32.xlu1 %v940_v24, %s3420_s20  ;;  %v3232_v24 = vld [vmem:[%s4466_s6 + $0x100] ss:$16 sps:$4 sm:$0xff]   ;;  %1886 = vmatprep.subr.bf16.mxu0 %v3237_v23 }
 0x3a0   : > { %v947_v26 = vpop.permute.xlu0 %946 }
 0x3a1   : > { %v951_v7 = vsub.f32 %v939_v16, %v947_v26  ;;  %v945_v28 = vpop.permute.xlu1 %944  ;;  %v3235_v26 = vld [vmem:[%s4466_s6 + $0x108] ss:$16 sps:$4 sm:$0xff]  }
 0x3a2   : > { %v950_v10 = vsub.f32 %v938_v15, %v945_v28  ;;  %v3243_v28 = vld [vmem:[%s4466_s6 + $0x12c] ss:$16 sps:$4 sm:$0xff]   ;;  %1887 = vmatpush1.bf16.msra.mxu0 %v3235_v26 }
 0x3a3   : > { %v953_v30 = vadd.f32 1e-05, %v951_v7  ;;  %v3240_v7 = vld [vmem:[%s4466_s6 + $0x124] ss:$16 sps:$4 sm:$0xff]   ;;  %1888 = vmatprep.subr.bf16.mxu0 %v3243_v28 }
 0x3a4   : > { %v952_v12 = vadd.f32 1e-05, %v950_v10  ;;  %v3238_v10 = vld [vmem:[%s4466_s6 + $0x120] ss:$16 sps:$4 sm:$0xff]  }
 0x3a6   : > { %3394 = vrsqrt.f32 %v952_v12  ;;  %v3246_v12 = vld [vmem:[%s4466_s6 + $0x144] ss:$16 sps:$4 sm:$0xff]  }
 0x3a7   : > { %3396 = vrsqrt.f32 %v953_v30  ;;  %v3241_v30 = vld [vmem:[%s4466_s6 + $0x128] ss:$16 sps:$4 sm:$0xff]  }
 0x3a8   : > { %1889 = vmatpush1.bf16.msra.mxu0 %v3241_v30 }
 0x3b0   : > { %v3395_v32 = vpop.eup %3394 }
 0x3b1   : > { %v956_v33 = vmul.f32 %v3395_v32, %v3515_v5  ;;  %v3397_v18 = vpop.eup %3396  ;;  %v3184_v5 = vld [vmem:[%s4466_s6] ss:$16 sps:$4 sm:$0xff]   ;;  %v3249_v32 = vld [vmem:[%s4466_s6 + $0x14c] ss:$16 sps:$4 sm:$0xff]  }
 0x3b2   : > { %v957_v36 = vmul.f32 %v3397_v18, %v3520_v6  ;;  %v3186_v6 = vld [vmem:[%s4466_s6 + $0x4] ss:$16 sps:$4 sm:$0xff]   ;;  %v3247_v18 = vld [vmem:[%s4466_s6 + $0x148] ss:$16 sps:$4 sm:$0xff]   ;;  %1890 = vmatprep.subr.bf16.mxu0 %v3249_v32 }
 0x3b3   : > { %960 = vrot.lane.b32.xlu1 %v956_v33, %s3417_s28  ;;  %1784 = vmatprep.subr.bf16.mxu1 %v3186_v6  ;;  %v3259_v6 = vld [vmem:[%s4466_s6 + $0x188] ss:$16 sps:$4 sm:$0xff]  }
 0x3b4   : > { %1785 = vmatpush1.bf16.msra.mxu1 %v3184_v5  ;;  %1891 = vmatpush1.bf16.msra.mxu0 %v3247_v18  ;;  %v3256_v5 = vld [vmem:[%s4466_s6 + $0x180] ss:$16 sps:$4 sm:$0xff]   ;;  %v3291_v18 = vld [vmem:[%s4466_s6 + $0x22c] ss:$16 sps:$4 sm:$0xff]  }
 0x3b5   : > { %1786 = vmatprep.subr.bf16.mxu1 %v3192_v44  ;;  %v3262_v44 = vld [vmem:[%s4466_s6 + $0x1a0] ss:$16 sps:$4 sm:$0xff]  }
 0x3b7   : > { %962 = vrot.lane.b32.xlu1 %v957_v36, %s3417_s28 }
 0x3b8   : > { %1787 = vmatpush1.bf16.msra.mxu1 %v3190_v46 }
 0x3b9   : > { %1788 = vmatprep.subr.bf16.mxu1 %v3198_v47 }
 0x3bc   : > { %1789 = vmatpush1.bf16.msra.mxu1 %v3196_v50  ;;  %v3273_v50 = vld [vmem:[%s4466_s6 + $0x1cc] ss:$16 sps:$4 sm:$0xff]  }
 0x3bd   : > { %1790 = vmatprep.subr.bf16.mxu1 %v3204_v55  ;;  %v3271_v55 = vld [vmem:[%s4466_s6 + $0x1c8] ss:$16 sps:$4 sm:$0xff]  }
 0x3c0   : > { %1791 = vmatpush1.bf16.msra.mxu1 %v3202_v57  ;;  %v3407_v57 = vld [vmem:[%s4463_s3 + $0x8] sm:$0xff] }
 0x3c1   : > { %1792 = vmatprep.subr.bf16.mxu1 %v3210_v37  ;;  %v3276_v37 = vld [vmem:[%s4466_s6 + $0x1e4] ss:$16 sps:$4 sm:$0xff]  }
 0x3c4   : > { %1793 = vmatpush1.bf16.msra.mxu1 %v3208_v52  ;;  %v3274_v52 = vld [vmem:[%s4466_s6 + $0x1e0] ss:$16 sps:$4 sm:$0xff]  }
 0x3c5   : > { %1794 = vmatprep.subr.bf16.mxu1 %v3216_v2  ;;  %v3282_v2 = vld [vmem:[%s4466_s6 + $0x204] ss:$16 sps:$4 sm:$0xff]  }
 0x3c8   : > { %1795 = vmatpush1.bf16.msra.mxu1 %v3214_v3  ;;  %v3926_v3 = vld [vmem:[%s401_s19 + $0x8] sm:$0xff] }
 0x3c9   : > { %1796 = vmatprep.subr.bf16.mxu1 %v3222_v8  ;;  %v3930_v8 = vld [vmem:[%s401_s19] sm:$0xff] }
 0x3ca   : > { %v3944_v13 = vpack.i.bf16 %v3932_v9, %v3930_v8 }
 0x3cc   : > { %1797 = vmatpush1.bf16.msra.mxu1 %v3220_v11  ;;  %v3936_v11 = vpack.i.bf16 %v3928_v4, %v3926_v3 }
 0x3cd   : > { %1798 = vmatprep.subr.bf16.mxu1 %v3228_v14 }
 0x425   : > { %v961_v19 = vpop.permute.xlu1 %960 }
 0x426   : > { %v966_v39 = vmul.f32 %v961_v19, %v938_v15  ;;  %v3234_v15 = vld [vmem:[%s4466_s6 + $0x104] ss:$16 sps:$4 sm:$0xff]   ;;  %v3255_v19 = vld [vmem:[%s4466_s6 + $0x16c] ss:$16 sps:$4 sm:$0xff]  }
 0x427   : > { %1892 = vmatprep.subr.bf16.mxu0 %v3255_v19  ;;  %v3286_v19 = vld [vmem:[%s4466_s6 + $0x220] ss:$16 sps:$4 sm:$0xff]  }
 0x428   : > { %970 = vrot.lane.b32.xlu0 %v966_v39, %s3422_s21  ;;  %v3250_v39 = vld [vmem:[%s4466_s6 + $0x160] ss:$16 sps:$4 sm:$0xff]  }
 0x429   : > { %v963_v40 = vpop.permute.xlu1 %962 }
 0x42a   : > { %v967_v41 = vmul.f32 %v963_v40, %v939_v16  ;;  %v3226_v16 = vld [vmem:[%s4466_s6 + $0xe0] ss:$16 sps:$4 sm:$0xff]   ;;  %v3253_v40 = vld [vmem:[%s4466_s6 + $0x168] ss:$16 sps:$4 sm:$0xff]  }
 0x42b   : > { %1799 = vmatpush1.bf16.msra.mxu1 %v3226_v16  ;;  %1893 = vmatpush1.bf16.msra.mxu0 %v3253_v40  ;;  %v3294_v40 = vld [vmem:[%s4466_s6 + $0x244] ss:$16 sps:$4 sm:$0xff]  }
 0x42c   : > { %979 = vperm.xlu0 %2934, %v956_v33   ;;  %972 = vrot.lane.b32.xlu1 %v967_v41, %s3422_s21  ;;  %v3244_v33 = vld [vmem:[%s4466_s6 + $0x140] ss:$16 sps:$4 sm:$0xff]   ;;  %v3258_v41 = vld [vmem:[%s4466_s6 + $0x184] ss:$16 sps:$4 sm:$0xff]  }
 0x42d   : > { %1800 = vmatprep.subr.bf16.mxu1 %v3234_v15 }
 0x42f   : > { %1801 = vmatpush1.bf16.msra.mxu1 %v3232_v24 }
 0x430   : > { %983 = vperm.xlu1 %2935, %v957_v36   ;;  %2937 = vset.pattern.permute.xlu0 %v3423_v42  ;;  %v3252_v36 = vld [vmem:[%s4466_s6 + $0x164] ss:$16 sps:$4 sm:$0xff]  }
 0x431   : > { %1802 = vmatprep.subr.bf16.mxu1 %v3240_v7 }
 0x433   : > { %1803 = vmatpush1.bf16.msra.mxu1 %v3238_v10 }
 0x434   : > { %2936 = vset.pattern.permute.xlu1 %v3423_v42  ;;  %1804 = vmatprep.subr.bf16.mxu1 %v3246_v12  ;;  %v3261_v42 = vld [vmem:[%s4466_s6 + $0x18c] ss:$16 sps:$4 sm:$0xff]  }
 0x435   : > { %1894 = vmatprep.subr.bf16.mxu0 %v3261_v42  ;;  %v3292_v42 = vld [vmem:[%s4466_s6 + $0x240] ss:$16 sps:$4 sm:$0xff]  }
 0x436   : > { %1895 = vmatpush1.bf16.msra.mxu0 %v3259_v6  ;;  %v3300_v6 = vld [vmem:[%s4466_s6 + $0x264] ss:$16 sps:$4 sm:$0xff]  }
 0x437   : > { %1805 = vmatpush1.bf16.msra.mxu1 %v3244_v33  ;;  %1896 = vmatprep.subr.bf16.mxu0 %v3267_v22  ;;  %v3298_v22 = vld [vmem:[%s4466_s6 + $0x260] ss:$16 sps:$4 sm:$0xff]  }
 0x438   : > { %1806 = vmatprep.subr.bf16.mxu1 %v3252_v36 }
 0x43a   : > { %1897 = vmatpush1.bf16.msra.mxu0 %v3265_v45  ;;  %v3306_v45 = vld [vmem:[%s4466_s6 + $0x284] ss:$16 sps:$4 sm:$0xff]  }
 0x43b   : > { %1807 = vmatpush1.bf16.msra.mxu1 %v3250_v39  ;;  %1898 = vmatprep.subr.bf16.mxu0 %v3273_v50  ;;  %v3289_v39 = vld [vmem:[%s4466_s6 + $0x228] ss:$16 sps:$4 sm:$0xff]   ;;  %v3315_v50 = vld [vmem:[%s4466_s6 + $0x2ac] ss:$16 sps:$4 sm:$0xff]  }
 0x43c   : > { %1808 = vmatprep.subr.bf16.mxu1 %v3258_v41  ;;  %v3297_v41 = vld [vmem:[%s4466_s6 + $0x24c] ss:$16 sps:$4 sm:$0xff]  }
 0x43e   : > { %1899 = vmatpush1.bf16.msra.mxu0 %v3271_v55  ;;  %v3313_v55 = vld [vmem:[%s4466_s6 + $0x2a8] ss:$16 sps:$4 sm:$0xff]  }
 0x43f   : > { %1809 = vmatpush1.bf16.msra.mxu1 %v3256_v5  ;;  %1900 = vmatprep.subr.bf16.mxu0 %v3279_v61  ;;  %v3295_v5 = vld [vmem:[%s4466_s6 + $0x248] ss:$16 sps:$4 sm:$0xff]   ;;  %v3324_v61 = vld [vmem:[%s4466_s6 + $0x2e4] ss:$16 sps:$4 sm:$0xff]  }
 0x440   : > { %1810 = vmatprep.subr.bf16.mxu1 %v3264_v43  ;;  %v3303_v43 = vld [vmem:[%s4466_s6 + $0x26c] ss:$16 sps:$4 sm:$0xff]  }
 0x442   : > { %1901 = vmatpush1.bf16.msra.mxu0 %v3277_v1  ;;  %v3322_v1 = vld [vmem:[%s4466_s6 + $0x2e0] ss:$16 sps:$4 sm:$0xff]  }
 0x443   : > { %1811 = vmatpush1.bf16.msra.mxu1 %v3262_v44  ;;  %1913 = vmatprep.subr.bf16.mxu0 %v3285_v62  ;;  %v3301_v44 = vld [vmem:[%s4466_s6 + $0x268] ss:$16 sps:$4 sm:$0xff]   ;;  %v3330_v62 = vld [vmem:[%s4466_s6 + $0x304] ss:$16 sps:$4 sm:$0xff]  }
 0x444   : > { %1812 = vmatprep.subr.bf16.mxu1 %v3270_v49  ;;  %v3312_v49 = vld [vmem:[%s4466_s6 + $0x2a4] ss:$16 sps:$4 sm:$0xff]  }
 0x447   : > { %1813 = vmatpush1.bf16.msra.mxu1 %v3268_v53  ;;  %v3310_v53 = vld [vmem:[%s4466_s6 + $0x2a0] ss:$16 sps:$4 sm:$0xff]  }
 0x448   : > { %1814 = vmatprep.subr.bf16.mxu1 %v3276_v37  ;;  %v3319_v37 = vld [vmem:[%s4466_s6 + $0x2c8] ss:$16 sps:$4 sm:$0xff]  }
 0x44b   : > { %1815 = vmatpush1.bf16.msra.mxu1 %v3274_v52  ;;  %v3327_v52 = vld [vmem:[%s4466_s6 + $0x2ec] ss:$16 sps:$4 sm:$0xff]  }
 0x44c   : > { %1827 = vmatprep.subr.bf16.mxu1 %v3282_v2  ;;  %v3325_v2 = vld [vmem:[%s4466_s6 + $0x2e8] ss:$16 sps:$4 sm:$0xff]  }
 0x49a   : > { %v971_v46 = vpop.permute.xlu0 %970 }
 0x49b   : > { %v976_v47 = vsub.f32 %v3406_v35, %v971_v46  ;;  %v3309_v46 = vld [vmem:[%s4466_s6 + $0x28c] ss:$16 sps:$4 sm:$0xff]   ;;  %v3304_v35 = vld [vmem:[%s4466_s6 + $0x280] ss:$16 sps:$4 sm:$0xff]  }
 0x49d   : > { %996 = vperm.xlu1 %2936, %v976_v47   ;;  %v3307_v47 = vld [vmem:[%s4466_s6 + $0x288] ss:$16 sps:$4 sm:$0xff]  }
 0x49e   : > { %v973_v56 = vpop.permute.xlu1 %972 }
 0x49f   : > { %v977_v59 = vsub.f32 %v3407_v57, %v973_v56  ;;  %v3318_v56 = vld [vmem:[%s4466_s6 + $0x2c4] ss:$16 sps:$4 sm:$0xff]   ;;  %v3321_v57 = vld [vmem:[%s4466_s6 + $0x2cc] ss:$16 sps:$4 sm:$0xff]  }
 0x4a1   : > { %1001 = vperm.xlu0 %2937, %v977_v59   ;;  %3173 = vset.pattern.permute.xlu1 %v3416_v0  ;;  %v3316_v59 = vld [vmem:[%s4466_s6 + $0x2c0] ss:$16 sps:$4 sm:$0xff]  }
 0x4a2   : > { %2939 = vrot.lane.b32.xlu1 %v3936_v11, %s3417_s28 }
 0x4a5   : > { %2944 = vrot.lane.b32.xlu0 %v3936_v11, %s3424_s22 }
 0x4a6   : > { %2954 = vrot.lane.b32.xlu1 %v3936_v11, %s3425_s23 }
 0x4a9   : > { %2949 = vrot.lane.b32.xlu0 %v3944_v13, %s3424_s22 }
 0x4aa   : > { %2969 = vrot.lane.b32.xlu1 %v3936_v11, %s3427_s25 }
 0x4ab   : > { %v3958_v54 = vpop.permute.xlu0 %979 }
 0x4ac   : > { %v986_v20 = vmul.f32 %v3958_v54, %v3659_v25  ;;  %v987_v15 = vmul.f32 %v3958_v54, %v3655_v21  ;;  %v989_v21 = vmul.f32 %v3958_v54, %v3687_v38  ;;  %v3288_v38 = vld [vmem:[%s4466_s6 + $0x224] ss:$16 sps:$4 sm:$0xff]  }
 0x4ad   : > { %2959 = vrot.lane.b32.xlu0 %v3936_v11, %s3426_s24 }
 0x4af   : > { %v3956_v14 = vpop.permute.xlu1 %983 }
 0x4b0   : > { %v990_v23 = vmul.f32 %v3956_v14, %v3675_v17  ;;  %v991_v24 = vmul.f32 %v3956_v14, %v3670_v29  ;;  %v993_v26 = vmul.f32 %v3956_v14, %v3695_v51  ;;  %v3280_v29 = vld [vmem:[%s4466_s6 + $0x200] ss:$16 sps:$4 sm:$0xff]   ;;  %v3283_v51 = vld [vmem:[%s4466_s6 + $0x208] ss:$16 sps:$4 sm:$0xff]  }
 0x4b1   : > { %2964 = vrot.lane.b32.xlu0 %v3944_v13, %s3426_s24 }
 0x51c   : > { %v3960_v16 = vpop.permute.xlu1 %996 }
 0x51d   : > { %v1004_v28 = vadd.f32 %v3960_v16, %v986_v20  ;;  %v1005_v10 = vadd.f32 %v3960_v16, %v987_v15  ;;  %v1007_v33 = vadd.f32 %v3960_v16, %v989_v21  ;;  %v3333_v20 = vld [vmem:[%s4466_s6 + $0x30c] ss:$16 sps:$4 sm:$0xff]   ;;  %v3328_v15 = vld [vmem:[%s4466_s6 + $0x300] ss:$16 sps:$4 sm:$0xff]  }
 0x51e   : > { %v3340_v21 = vld [vmem:[%s4466_s6 + $0x340] ss:$16 sps:$4 sm:$0xff]  }
 0x520   : > { %v3972_v7 = vpop.permute.xlu0 %1001 }
 0x521   : > { %v1008_v25 = vadd.f32 %v3972_v7, %v990_v23  ;;  %v1009_v30 = vadd.f32 %v3972_v7, %v991_v24  ;;  %v1011_v17 = vadd.f32 %v3972_v7, %v993_v26  ;;  %v3331_v23 = vld [vmem:[%s4466_s6 + $0x308] ss:$16 sps:$4 sm:$0xff]   ;;  %v3336_v24 = vld [vmem:[%s4466_s6 + $0x324] ss:$16 sps:$4 sm:$0xff]   ;;  %v3339_v26 = vld [vmem:[%s4466_s6 + $0x32c] ss:$16 sps:$4 sm:$0xff]  }
 0x523   : > { %v1013_v12 = vpack.c.bf16 %v1009_v30, %v1005_v10  ;;  %v1012_v32 = vpack.c.bf16 %v1008_v25, %v1004_v28  ;;  %v1015_v36 = vpack.c.bf16 %v1011_v17, %v1007_v33  ;;  %v3334_v28 = vld [vmem:[%s4466_s6 + $0x320] ss:$16 sps:$4 sm:$0xff]   ;;  %v3337_v10 = vld [vmem:[%s4466_s6 + $0x328] ss:$16 sps:$4 sm:$0xff]   ;;  %v3342_v25 = vld [vmem:[%s4466_s6 + $0x344] ss:$16 sps:$4 sm:$0xff]  }
 0x524   : > { %v3345_v30 = vld [vmem:[%s4466_s6 + $0x34c] ss:$16 sps:$4 sm:$0xff]   ;;  %v3343_v17 = vld [vmem:[%s4466_s6 + $0x348] ss:$16 sps:$4 sm:$0xff]   ;;  %v3354_v33 = vld [vmem:[%s4466_s6 + $0x384] ss:$16 sps:$4 sm:$0xff]  }
 0x525   : > { %1816 = vmatprep.mubr.bf16.mxu1 %v1013_v12  ;;  %1902 = vmatprep.mubr.bf16.mxu0 %v1013_v12  ;;  %v3348_v12 = vld [vmem:[%s4466_s6 + $0x364] ss:$16 sps:$4 sm:$0xff]  }
 0x526   : > { %1817 = vmatmul.mubr.bf16.vlgmr.msra.gmra.mrb[4].mxu1 %v1012_v32  ;;  %1903 = vmatmul.mubr.bf16.vlgmr.msra.gmra.mrb[36].mxu0 %v1012_v32  ;;  %v3349_v32 = vld [vmem:[%s4466_s6 + $0x368] ss:$16 sps:$4 sm:$0xff]  }
 0x527   : > { %1828 = vmatpush1.bf16.msra.mxu1 %v3280_v29  ;;  %1914 = vmatpush1.bf16.msra.mxu0 %v3283_v51  ;;  %v3351_v29 = vld [vmem:[%s4466_s6 + $0x36c] ss:$16 sps:$4 sm:$0xff]   ;;  %v3346_v51 = vld [vmem:[%s4466_s6 + $0x360] ss:$16 sps:$4 sm:$0xff]  }
 0x528   : > { %1859 = vmatprep.mubr.bf16.mxu1 %v1015_v36  ;;  %1945 = vmatprep.mubr.bf16.mxu0 %v1015_v36  ;;  %v3355_v36 = vld [vmem:[%s4466_s6 + $0x388] ss:$16 sps:$4 sm:$0xff]  }
 0x529   : > { %1829 = vmatprep.subr.bf16.mxu1 %v3288_v38  ;;  %1915 = vmatprep.subr.bf16.mxu0 %v3291_v18  ;;  %v3357_v38 = vld [vmem:[%s4466_s6 + $0x38c] ss:$16 sps:$4 sm:$0xff]   ;;  %v3352_v18 = vld [vmem:[%s4466_s6 + $0x380] ss:$16 sps:$4 sm:$0xff]  }
 0x52b   : > { %1830 = vmatpush1.bf16.msra.mxu1 %v3286_v19  ;;  %1916 = vmatpush1.bf16.msra.mxu0 %v3289_v39  ;;  %v3360_v19 = vld [vmem:[%s4466_s6 + $0x3a4] ss:$16 sps:$4 sm:$0xff]   ;;  %v3363_v39 = vld [vmem:[%s4466_s6 + $0x3ac] ss:$16 sps:$4 sm:$0xff]  }
 0x52c   : > { %1831 = vmatprep.subr.bf16.mxu1 %v3294_v40  ;;  %1917 = vmatprep.subr.bf16.mxu0 %v3297_v41  ;;  %v3358_v40 = vld [vmem:[%s4466_s6 + $0x3a0] ss:$16 sps:$4 sm:$0xff]   ;;  %v3361_v41 = vld [vmem:[%s4466_s6 + $0x3a8] ss:$16 sps:$4 sm:$0xff]  }
 0x52f   : > { %1832 = vmatpush1.bf16.msra.mxu1 %v3292_v42  ;;  %1918 = vmatpush1.bf16.msra.mxu0 %v3295_v5  ;;  %v3366_v42 = vld [vmem:[%s4466_s6 + $0x3c4] ss:$16 sps:$4 sm:$0xff]   ;;  %v3369_v5 = vld [vmem:[%s4466_s6 + $0x3cc] ss:$16 sps:$4 sm:$0xff]  }
 0x530   : > { %1833 = vmatprep.subr.bf16.mxu1 %v3300_v6  ;;  %1919 = vmatprep.subr.bf16.mxu0 %v3303_v43  ;;  %v3364_v6 = vld [vmem:[%s4466_s6 + $0x3c0] ss:$16 sps:$4 sm:$0xff]   ;;  %v3367_v43 = vld [vmem:[%s4466_s6 + $0x3c8] ss:$16 sps:$4 sm:$0xff]  }
 0x533   : > { %1834 = vmatpush1.bf16.msra.mxu1 %v3298_v22  ;;  %1920 = vmatpush1.bf16.msra.mxu0 %v3301_v44  ;;  %v3372_v22 = vld [vmem:[%s4466_s6 + $0x3e4] ss:$16 sps:$4 sm:$0xff]   ;;  %v3375_v44 = vld [vmem:[%s4466_s6 + $0x3ec] ss:$16 sps:$4 sm:$0xff]  }
 0x534   : > { %1835 = vmatprep.subr.bf16.mxu1 %v3306_v45  ;;  %1921 = vmatprep.subr.bf16.mxu0 %v3309_v46  ;;  %v992_v45 = vmul.f32 %v3956_v14, %v3681_v34  ;;  %v3370_v46 = vld [vmem:[%s4466_s6 + $0x3e0] ss:$16 sps:$4 sm:$0xff]  }
 0x537   : > { %1836 = vmatpush1.bf16.msra.mxu1 %v3304_v35  ;;  %1922 = vmatpush1.bf16.msra.mxu0 %v3307_v47  ;;  %v3373_v35 = vld [vmem:[%s4466_s6 + $0x3e8] ss:$16 sps:$4 sm:$0xff]   ;;  %v988_v47 = vmul.f32 %v3958_v54, %v3664_v27 }
 0x538   : > { %1837 = vmatprep.subr.bf16.mxu1 %v3312_v49  ;;  %1923 = vmatprep.subr.bf16.mxu0 %v3315_v50  ;;  %v1010_v49 = vadd.f32 %v3972_v7, %v992_v45 }
 0x539   : > { %v1006_v50 = vadd.f32 %v3960_v16, %v988_v47 }
 0x53b   : > { %1838 = vmatpush1.bf16.msra.mxu1 %v3310_v53  ;;  %1924 = vmatpush1.bf16.msra.mxu0 %v3313_v55  ;;  %v1014_v34 = vpack.c.bf16 %v1010_v49, %v1006_v50 }
 0x53c   : > { %1839 = vmatprep.subr.bf16.mxu1 %v3318_v56  ;;  %1925 = vmatprep.subr.bf16.mxu0 %v3321_v57 }
 0x53f   : > { %1840 = vmatpush1.bf16.msra.mxu1 %v3316_v59  ;;  %1926 = vmatpush1.bf16.msra.mxu0 %v3319_v37 }
 0x540   : > { %1841 = vmatprep.subr.bf16.mxu1 %v3324_v61  ;;  %1927 = vmatprep.subr.bf16.mxu0 %v3327_v52 }
 0x543   : > { %1842 = vmatpush1.bf16.msra.mxu1 %v3322_v1  ;;  %1928 = vmatpush1.bf16.msra.mxu0 %v3325_v2 }
 0x544   : > { %1843 = vmatprep.subr.bf16.mxu1 %v3330_v62  ;;  %1929 = vmatprep.subr.bf16.mxu0 %v3333_v20 }
 0x547   : > { %1844 = vmatpush1.bf16.msra.mxu1 %v3328_v15  ;;  %1930 = vmatpush1.bf16.msra.mxu0 %v3331_v23 }
 0x548   : > { %1845 = vmatprep.subr.bf16.mxu1 %v3336_v24  ;;  %1931 = vmatprep.subr.bf16.mxu0 %v3339_v26  ;;  %v4218_v24 = vld [vmem:[%s4468_s8] sm:$0xff] }
 0x54b   : > { %1846 = vmatpush1.bf16.msra.mxu1 %v3334_v28  ;;  %1932 = vmatpush1.bf16.msra.mxu0 %v3337_v10  ;;  %v2940_v28 = vpop.permute.xlu1 %2939 }
 0x54c   : > { %1847 = vmatprep.subr.bf16.mxu1 %v3342_v25  ;;  %1933 = vmatprep.subr.bf16.mxu0 %v3345_v30 }
 0x54f   : > { %1848 = vmatpush1.bf16.msra.mxu1 %v3340_v21  ;;  %1934 = vmatpush1.bf16.msra.mxu0 %v3343_v17  ;;  %v4228_v25 = vpop.permute.xlu1 %2954 }
 0x550   : > { %1849 = vmatprep.subr.bf16.mxu1 %v3348_v12  ;;  %1935 = vmatprep.subr.bf16.mxu0 %v3351_v29 }
 0x553   : > { %1850 = vmatpush1.bf16.msra.mxu1 %v3346_v51  ;;  %1936 = vmatpush1.bf16.msra.mxu0 %v3349_v32  ;;  %v4232_v21 = vpop.permute.xlu1 %2969 }
 0x554   : > { %1851 = vmatprep.subr.bf16.mxu1 %v3354_v33  ;;  %1937 = vmatprep.subr.bf16.mxu0 %v3357_v38 }
 0x557   : > { %1852 = vmatpush1.bf16.msra.mxu1 %v3352_v18  ;;  %1938 = vmatpush1.bf16.msra.mxu0 %v3355_v36 }
 0x558   : > { %1853 = vmatprep.subr.bf16.mxu1 %v3360_v19  ;;  %1939 = vmatprep.subr.bf16.mxu0 %v3363_v39 }
 0x55b   : > { %1854 = vmatpush1.bf16.msra.mxu1 %v3358_v40  ;;  %1940 = vmatpush1.bf16.msra.mxu0 %v3361_v41 }
 0x55c   : > { %1855 = vmatprep.subr.bf16.mxu1 %v3366_v42  ;;  %1941 = vmatprep.subr.bf16.mxu0 %v3369_v5 }
 0x55f   : > { %1856 = vmatpush1.bf16.msra.mxu1 %v3364_v6  ;;  %1942 = vmatpush1.bf16.msra.mxu0 %v3367_v43 }
 0x560   : > { %1857 = vmatprep.subr.bf16.mxu1 %v3372_v22  ;;  %1943 = vmatprep.subr.bf16.mxu0 %v3375_v44 }
 0x563   : > { %1858 = vmatpush1.bf16.msra.mxu1 %v3370_v46  ;;  %1944 = vmatpush1.bf16.msra.mxu0 %v3373_v35 }
 0x564   : > { %2425 = vmatprep.subr.bf16.mxu0 %v3416_v0 }
 0x566   : > { %1860 = vmatmul.mubr.bf16.vlgmr.msra.gmra.mrb[4].mxu1 %v1014_v34  ;;  %1946 = vmatmul.mubr.bf16.vlgmr.msra.gmra.mrb[36].mxu0 %v1014_v34 }
 0x639   : > { %v1861_v14 = vpop.f32.mrb[4].mxu1  ;;  %v1947_v53 = vpop.f32.mrb[36].mxu0 }
 0x63a   : > { %v1863_v55 = vpop.f32.mrb[5].mxu1  ;;  %v1949_v56 = vpop.f32.mrb[37].mxu0 }
 0x63b   : > { %v1865_v57 = vpop.f32.mrb[6].mxu1  ;;  %v1951_v59 = vpop.f32.mrb[38].mxu0  ;;  %v2983_v27 = vpack.i.bf16 %v1947_v53, %v1863_v55  ;;  %v2978_v54 = vpack.i.bf16 %v1949_v56, %v1861_v14 }
 0x63c   : > { %v1867_v7 = vpop.f32.mrb[7].mxu1  ;;  %v1953_v37 = vpop.f32.mrb[39].mxu0  ;;  %v2318_v61 = vpack.c.bf16 %v1951_v59, %v1947_v53  ;;  %v2316_v52 = vpack.c.bf16 %v1865_v57, %v1861_v14  ;;  %v3018_v1 = vpack.i.bf16 %v1865_v57, %v1861_v14  ;;  %v3013_v20 = vpack.i.bf16 %v3930_v8, %v1865_v57 }
 0x63d   : > { %2984 = vrot.lane.b32.xlu0 %v2983_v27, %s3424_s22  ;;  %2974 = vrot.lane.b32.xlu1 %v2983_v27, %s3417_s28  ;;  %v2317_v16 = vpack.c.bf16 %v1867_v7, %v1863_v55  ;;  %v3058_v2 = vpack.i.bf16 %v1951_v59, %v1867_v7  ;;  %v3063_v62 = vpack.i.bf16 %v1953_v37, %v1949_v56 }
 0x63e   : > { %2426 = vmatpush1.bf16.msra.mxu0 %v2318_v61  ;;  %v3053_v15 = vpack.i.bf16 %v3932_v9, %v1953_v37 }
 0x63f   : > { %2384 = vmatprep.subr.bf16.mxu1 %v2317_v16  ;;  %2427 = vmatprep.subr.bf16.mxu0 %v3416_v0 }
 0x640   : > { %2385 = vmatpush1.bf16.msra.mxu1 %v2316_v52 }
 0x641   : > { %2999 = vrot.lane.b32.xlu0 %v2983_v27, %s3426_s24  ;;  %2979 = vrot.lane.b32.xlu1 %v2978_v54, %s3417_s28 }
 0x645   : > { %2989 = vrot.lane.b32.xlu1 %v2983_v27, %s3425_s23  ;;  %3014 = vrot.lane.b32.xlu0 %v3013_v20, %s3417_s28 }
 0x649   : > { %2994 = vrot.lane.b32.xlu1 %v2978_v54, %s3425_s23  ;;  %3019 = vrot.lane.b32.xlu0 %v3018_v1, %s3424_s22 }
 0x64d   : > { %3004 = vrot.lane.b32.xlu1 %v2983_v27, %s3427_s25  ;;  %3024 = vrot.lane.b32.xlu0 %v3013_v20, %s3425_s23 }
 0x651   : > { %3009 = vrot.lane.b32.xlu1 %v2978_v54, %s3427_s25  ;;  %3029 = vrot.lane.b32.xlu0 %v3018_v1, %s3426_s24 }
 0x655   : > { %3054 = vrot.lane.b32.xlu1 %v3053_v15, %s3417_s28  ;;  %3034 = vrot.lane.b32.xlu0 %v3013_v20, %s3427_s25 }
 0x659   : > { %3059 = vrot.lane.b32.xlu1 %v3058_v2, %s3424_s22  ;;  %3039 = vrot.lane.b32.xlu0 %v3058_v2, %s3417_s28 }
 0x65d   : > { %3064 = vrot.lane.b32.xlu1 %v3063_v62, %s3424_s22  ;;  %3044 = vrot.lane.b32.xlu0 %v2983_v27, %s3428_s12  ;;  %s3430_s22 = smov 78  }
 0x661   : > { %3079 = vrot.lane.b32.xlu1 %v2983_v27, %s3429_s13  ;;  %3049 = vrot.lane.b32.xlu0 %v3018_v1, %s3428_s12 }
 0x665   : > { %3089 = vrot.lane.b32.xlu1 %v2978_v54, %s3429_s13  ;;  %3069 = vrot.lane.b32.xlu0 %v3058_v2, %s3425_s23 }
 0x669   : > { %3094 = vrot.lane.b32.xlu1 %v3936_v11, %s3429_s13  ;;  %3074 = vrot.lane.b32.xlu0 %v3936_v11, %s3428_s12  ;;  %v3153_v11 = vpack.i.bf16 %v3926_v3, %v3930_v8 }
 0x66d   : > { %3099 = vrot.lane.b32.xlu1 %v3053_v15, %s3425_s23  ;;  %3084 = vrot.lane.b32.xlu0 %v3944_v13, %s3428_s12  ;;  %v4210_v13 = vld [vmem:[%s4467_s7] sm:$0xff] }
 0x66e   : > { %v2865_v23 = vcombine.high %v4210_v13, %v4210_v13 }
 0x670   : > { %2867 = vmatprep.mubr.msk.bf16.mxu1 %vm2370_vm5, %v2865_v23  ;;  %2868 = vmatprep.mubr.msk.bf16.mxu0 %vm2370_vm5, %v2865_v23 }
 0x671   : > { %3104 = vrot.lane.b32.xlu1 %v3058_v2, %s3426_s24  ;;  %3114 = vrot.lane.b32.xlu0 %v3058_v2, %s3427_s25 }
 0x675   : > { %3109 = vrot.lane.b32.xlu1 %v3063_v62, %s3426_s24  ;;  %3119 = vrot.lane.b32.xlu0 %v3013_v20, %s3429_s13 }
 0x679   : > { %3129 = vrot.lane.b32.xlu1 %v3053_v15, %s3427_s25  ;;  %3124 = vrot.lane.b32.xlu0 %v2983_v27, %s3430_s22 }
 0x67d   : > { %3134 = vrot.lane.b32.xlu1 %v3058_v2, %s3428_s12  ;;  %3144 = vrot.lane.b32.xlu0 %v3058_v2, %s3429_s13 }
 0x681   : > { %3139 = vrot.lane.b32.xlu1 %v3063_v62, %s3428_s12  ;;  %3149 = vrot.lane.b32.xlu0 %v3018_v1, %s3430_s22 }
 0x685   : > { %3159 = vrot.lane.b32.xlu1 %v3053_v15, %s3429_s13  ;;  %3154 = vrot.lane.b32.xlu0 %v3153_v11, %s3430_s22 }
 0x689   : > { %3164 = vrot.lane.b32.xlu1 %v3058_v2, %s3430_s22  ;;  %2294 = vrot.lane.b32.xlu0 %v3932_v9, %s3430_s22  ;;  %v4221_v9 = vpop.permute.xlu0 %2944 }
 0x68a   : > { %v2947_v47 = vunpack.i.h.bf16 %v4221_v9  ;;  %v2946_v50 = vunpack.i.l.bf16 %v4221_v9 }
 0x68d   : > { %3169 = vrot.lane.b32.xlu1 %v3063_v62, %s3430_s22  ;;  %v4224_v26 = vpop.permute.xlu0 %2949 }
 0x691   : > { %2292 = vrot.lane.b32.xlu1 %v3928_v4, %s3430_s22  ;;  %v4226_v10 = vpop.permute.xlu0 %2959 }
 0x695   : > { %2361 = vperm.xlu1 %3173, %v4218_v24   ;;  %v4230_v30 = vpop.permute.xlu0 %2964 }
 0x699   : > { %3174 = vset.pattern.permute.xlu1 %v3421_v31 }
 0x6af   : > { %v4234_v17 = vpop.permute.xlu0 %2984  ;;  %v2975_v12 = vpop.permute.xlu1 %2974 }
 0x6b0   : > { %v2977_v29 = vunpack.i.h.bf16 %v2975_v12  ;;  %v2976_v51 = vunpack.i.l.bf16 %v2975_v12  ;;  %v2987_v53 = vunpack.i.h.bf16 %v4234_v17  ;;  %v2986_v55 = vunpack.i.l.bf16 %v4234_v17 }
 0x6b2   : > { %v1997_v32 = vsel %vm643_vm2, %v2976_v51, %v2977_v29 }
 0x6b3   : > { %v4237_v33 = vpop.permute.xlu0 %2999  ;;  %v2980_v31 = vpop.permute.xlu1 %2979  ;;  %v2320_v38 = vpack.c.bf16 %v1997_v32, %v3926_v3 }
 0x6b4   : > { %v2982_v18 = vunpack.i.h.bf16 %v2980_v31  ;;  %v2981_v36 = vunpack.i.l.bf16 %v2980_v31 }
 0x6b5   : > { %2386 = vmatprep.subr.bf16.mxu1 %v2320_v38 }
 0x6b6   : > { %v1996_v19 = vsel %vm643_vm2, %v2981_v36, %v2976_v51  ;;  %v1998_v39 = vsel %vm643_vm2, %v2977_v29, %v2982_v18  ;;  %v2040_v18 = vsel %vm2038_vm6, %v2986_v55, %v2987_v53 }
 0x6b7   : > { %v2319_v40 = vpack.c.bf16 %v1996_v19, %v3930_v8  ;;  %v2321_v41 = vpack.c.bf16 %v1998_v39, %v3928_v4  ;;  %v3015_v42 = vpop.permute.xlu0 %3014  ;;  %v4244_v5 = vpop.permute.xlu1 %2989  ;;  %v2942_v8 = vunpack.i.h.bf16 %v2940_v28  ;;  %v2941_v4 = vunpack.i.l.bf16 %v2940_v28 }
 0x6b8   : > { %v3017_v49 = vunpack.i.h.bf16 %v3015_v42  ;;  %v3016_v56 = vunpack.i.l.bf16 %v3015_v42  ;;  %v2992_v57 = vunpack.i.h.bf16 %v4244_v5  ;;  %v2991_v54 = vunpack.i.l.bf16 %v4244_v5 }
 0x6b9   : > { %2387 = vmatpush1.bf16.msra.mxu1 %v2319_v40  ;;  %2428 = vmatpush1.bf16.msra.mxu0 %v2321_v41  ;;  %v2003_v14 = vsel %vm643_vm2, %v2941_v4, %v2942_v8  ;;  %v2952_v41 = vunpack.i.h.bf16 %v4224_v26 }
 0x6ba   : > { %2429 = vmatprep.subr.bf16.mxu0 %v3416_v0  ;;  %v2002_v52 = vsel %vm643_vm2, %v3017_v49, %v2941_v4  ;;  %v2083_v40 = vsel %vm2081_vm7, %v2991_v54, %v2992_v57 }
 0x6bb   : > { %v3020_v6 = vpop.permute.xlu0 %3019  ;;  %v4247_v3 = vpop.permute.xlu1 %2994 }
 0x6bc   : > { %v3022_v16 = vunpack.i.h.bf16 %v3020_v6  ;;  %v3021_v23 = vunpack.i.l.bf16 %v3020_v6  ;;  %v2997_v32 = vunpack.i.h.bf16 %v4247_v3  ;;  %v2996_v36 = vunpack.i.l.bf16 %v4247_v3 }
 0x6bd   : > { %v2951_v3 = vunpack.i.l.bf16 %v4224_v26  ;;  %v2047_v26 = vsel %vm2038_vm6, %v2947_v47, %v2952_v41 }
 0x6bf   : > { %v4249_v43 = vpop.permute.xlu0 %3024  ;;  %v4251_v22 = vpop.permute.xlu1 %3004 }
 0x6c3   : > { %v4253_v44 = vpop.permute.xlu0 %3029  ;;  %v4255_v45 = vpop.permute.xlu1 %3009 }
 0x6c7   : > { %v4257_v46 = vpop.permute.xlu0 %3034  ;;  %v3055_v35 = vpop.permute.xlu1 %3054 }
 0x6c8   : > { %v3057_v34 = vunpack.i.h.bf16 %v3055_v35  ;;  %v3056_v7 = vunpack.i.l.bf16 %v3055_v35 }
 0x6ca   : > { %v2004_v62 = vsel %vm643_vm2, %v2942_v8, %v3057_v34  ;;  %v2039_v8 = vsel %vm2038_vm6, %v3021_v23, %v2986_v55  ;;  %v2084_v34 = vsel %vm2081_vm7, %v2992_v57, %v2997_v32  ;;  %v2957_v55 = vunpack.i.h.bf16 %v4228_v25 }
 0x6cb   : > { %v3040_v59 = vpop.permute.xlu0 %3039  ;;  %v3060_v27 = vpop.permute.xlu1 %3059  ;;  %v2045_v57 = vsel %vm2038_vm6, %v2951_v3, %v2946_v50  ;;  %v2961_v23 = vunpack.i.l.bf16 %v4226_v10  ;;  %v3002_v32 = vunpack.i.h.bf16 %v4237_v33  ;;  %v3032_v3 = vunpack.i.h.bf16 %v4253_v44 }
 0x6cc   : > { %v3042_v37 = vunpack.i.h.bf16 %v3040_v59  ;;  %v3041_v61 = vunpack.i.l.bf16 %v3040_v59  ;;  %v3062_v1 = vunpack.i.h.bf16 %v3060_v27  ;;  %v3061_v2 = vunpack.i.l.bf16 %v3060_v27 }
 0x6cd   : > { %v2956_v27 = vunpack.i.l.bf16 %v4228_v25 }
 0x6ce   : > { %v1999_v20 = vsel %vm643_vm2, %v3016_v56, %v3041_v61  ;;  %v2001_v15 = vsel %vm643_vm2, %v3042_v37, %v3056_v7  ;;  %v2000_v11 = vsel %vm643_vm2, %v3041_v61, %v3042_v37  ;;  %v2042_v19 = vsel %vm2038_vm6, %v3022_v16, %v3061_v2 }
 0x6cf   : > { %v2322_v28 = vpack.c.bf16 %v2002_v52, %v1999_v20  ;;  %v2324_v17 = vpack.c.bf16 %v2004_v62, %v2001_v15  ;;  %v4271_v12 = vpop.permute.xlu0 %3044  ;;  %v3065_v29 = vpop.permute.xlu1 %3064  ;;  %v2323_v51 = vpack.c.bf16 %v2003_v14, %v2000_v11  ;;  %v2043_v39 = vsel %vm2038_vm6, %v3061_v2, %v3062_v1 }
 0x6d0   : > { %v3067_v31 = vunpack.i.h.bf16 %v3065_v29  ;;  %v3066_v38 = vunpack.i.l.bf16 %v3065_v29  ;;  %v2326_v6 = vpack.c.bf16 %v2043_v39, %v2040_v18  ;;  %v2325_v14 = vpack.c.bf16 %v2042_v19, %v2039_v8 }
 0x6d1   : > { %2388 = vmatprep.subr.bf16.mxu1 %v2323_v51  ;;  %2430 = vmatpush1.bf16.msra.mxu0 %v2324_v17  ;;  %v2082_v56 = vsel %vm2081_vm7, %v2996_v36, %v2991_v54  ;;  %v3027_v7 = vunpack.i.h.bf16 %v4249_v43  ;;  %v2330_v37 = vpack.c.bf16 %v2084_v34, %v2047_v26  ;;  %v2966_v17 = vunpack.i.l.bf16 %v4230_v30 }
 0x6d2   : > { %v2041_v42 = vsel %vm2038_vm6, %v2987_v53, %v3066_v38  ;;  %v2044_v5 = vsel %vm2038_vm6, %v3062_v1, %v3067_v31  ;;  %2389 = vmatpush1.bf16.msra.mxu1 %v2322_v28  ;;  %2431 = vmatprep.subr.bf16.mxu0 %v3416_v0  ;;  %v2046_v53 = vsel %vm2038_vm6, %v2946_v50, %v2947_v47  ;;  %v3026_v47 = vunpack.i.l.bf16 %v4249_v43 }
 0x6d3   : > { %v2327_v4 = vpack.c.bf16 %v2044_v5, %v2041_v42  ;;  %v4285_v35 = vpop.permute.xlu0 %3049  ;;  %v4287_v49 = vpop.permute.xlu1 %3079  ;;  %2390 = vmatprep.subr.bf16.mxu1 %v2326_v6  ;;  %v2329_v59 = vpack.c.bf16 %v2083_v40, %v2046_v53  ;;  %v2328_v52 = vpack.c.bf16 %v2082_v56, %v2045_v57  ;;  %v2088_v25 = vsel %vm2081_vm7, %v3027_v7, %v2956_v27 }
 0x6d4   : > { %v2089_v50 = vsel %vm2081_vm7, %v2956_v27, %v2957_v55  ;;  %v2962_v43 = vunpack.i.h.bf16 %v4226_v10  ;;  %v2967_v28 = vunpack.i.h.bf16 %v4230_v30  ;;  %vm2124_vm2 = vcmask 842752  }
 0x6d5   : > { %2432 = vmatpush1.bf16.msra.mxu0 %v2327_v4  ;;  %v3001_v18 = vunpack.i.l.bf16 %v4237_v33  ;;  %v3007_v36 = vunpack.i.h.bf16 %v4251_v22  ;;  %v3006_v19 = vunpack.i.l.bf16 %v4251_v22  ;;  %v3031_v10 = vunpack.i.l.bf16 %v4253_v44 }
 0x6d6   : > { %2391 = vmatpush1.bf16.msra.mxu1 %v2325_v14  ;;  %2433 = vmatprep.subr.bf16.mxu0 %v3416_v0  ;;  %v2972_v39 = vunpack.i.h.bf16 %v4232_v21  ;;  %v2971_v30 = vunpack.i.l.bf16 %v4232_v21  ;;  %v2131_v42 = vsel %vm2124_vm2, %v2966_v17, %v2961_v23  ;;  %v4331_v5 = vsel %vm2124_vm2, %v2962_v43, %v2967_v28 }
 0x6d7   : > { %v3070_v61 = vpop.permute.xlu0 %3069  ;;  %v4302_v54 = vpop.permute.xlu1 %3089  ;;  %2392 = vmatprep.subr.bf16.mxu1 %v2329_v59  ;;  %v3011_v8 = vunpack.i.l.bf16 %v4255_v45  ;;  %v2125_v14 = vsel %vm2124_vm2, %v3031_v10, %v3001_v18  ;;  %v3012_v53 = vunpack.i.h.bf16 %v4255_v45  ;;  %v2126_v56 = vsel %vm2124_vm2, %v3001_v18, %v3002_v32 }
 0x6d8   : > { %v3072_v16 = vunpack.i.h.bf16 %v3070_v61  ;;  %v3071_v1 = vunpack.i.l.bf16 %v3070_v61  ;;  %v2169_v59 = vsel %vm2167_vm8, %v3006_v19, %v3007_v36  ;;  %v2132_v61 = vsel %vm2124_vm2, %v2961_v23, %v2962_v43 }
 0x6d9   : > { %2434 = vmatpush1.bf16.msra.mxu0 %v2330_v37  ;;  %v3051_v17 = vunpack.i.l.bf16 %v4285_v35  ;;  %vm3432_vm6 = vmmov 0  }
 0x6da   : > { %v2085_v2 = vsel %vm2081_vm7, %v3026_v47, %v3071_v1  ;;  %2393 = vmatpush1.bf16.msra.mxu1 %v2328_v52  ;;  %v2086_v9 = vsel %vm2081_vm7, %v3071_v1, %v3072_v16  ;;  %2435 = vmatprep.subr.bf16.mxu0 %v3416_v0  ;;  %v2175_v52 = vsel %vm2167_vm8, %v2971_v30, %v2972_v39 }
 0x6db   : > { %v2331_v62 = vpack.c.bf16 %v2088_v25, %v2085_v2  ;;  %v4309_v20 = vpop.permute.xlu0 %3074  ;;  %v4311_v15 = vpop.permute.xlu1 %3094  ;;  %v2332_v11 = vpack.c.bf16 %v2089_v50, %v2086_v9  ;;  %v2168_v47 = vsel %vm2167_vm8, %v3011_v8, %v3006_v19  ;;  %v2338_v25 = vpack.c.bf16 %v2169_v59, %v2132_v61 }
 0x6dc   : > { %v2170_v2 = vsel %vm2167_vm8, %v3007_v36, %v3012_v53  ;;  %v3037_v9 = vunpack.i.h.bf16 %v4257_v46  ;;  %v3036_v50 = vunpack.i.l.bf16 %v4257_v46  ;;  %v3077_v10 = vunpack.i.h.bf16 %v4309_v20 }
 0x6dd   : > { %2394 = vmatprep.subr.bf16.mxu1 %v2332_v11  ;;  %v3046_v11 = vunpack.i.l.bf16 %v4271_v12  ;;  %v3096_v59 = vunpack.i.l.bf16 %v4311_v15 }
 0x6de   : > { %2395 = vmatpush1.bf16.msra.mxu1 %v2331_v62  ;;  %v3047_v62 = vunpack.i.h.bf16 %v4271_v12 }
 0x6df   : > { %v4318_v29 = vpop.permute.xlu0 %3084  ;;  %v3100_v51 = vpop.permute.xlu1 %3099 }
 0x6e0   : > { %v3102_v31 = vunpack.i.h.bf16 %v3100_v51  ;;  %v3101_v38 = vunpack.i.l.bf16 %v3100_v51 }
 0x6e2   : > { %v2087_v40 = vsel %vm2081_vm7, %v3072_v16, %v3101_v38  ;;  %v2090_v41 = vsel %vm2081_vm7, %v2957_v55, %v3102_v31  ;;  %v2337_v38 = vpack.c.bf16 %v2168_v47, %v2131_v42  ;;  %v2212_v42 = vsel %vm2210_vm9, %v3046_v11, %v3047_v62 }
 0x6e3   : > { %v2333_v33 = vpack.c.bf16 %v2090_v41, %v2087_v40  ;;  %v4333_v6 = vpop.permute.xlu0 %3114  ;;  %v3105_v22 = vpop.permute.xlu1 %3104  ;;  %v3076_v40 = vunpack.i.l.bf16 %v4309_v20  ;;  %v3091_v20 = vunpack.i.l.bf16 %v4302_v54  ;;  %vm2517_vm7 = vcmask 64512  }
 0x6e4   : > { %v3107_v4 = vunpack.i.h.bf16 %v3105_v22  ;;  %v3106_v34 = vunpack.i.l.bf16 %v3105_v22  ;;  %v3117_v26 = vunpack.i.h.bf16 %v4333_v6  ;;  %v3116_v55 = vunpack.i.l.bf16 %v4333_v6 }
 0x6e5   : > { %2436 = vmatpush1.bf16.msra.mxu0 %v2333_v33  ;;  %v2174_v33 = vsel %vm2167_vm8, %v3037_v9, %v2971_v30  ;;  %v3052_v6 = vunpack.i.h.bf16 %v4285_v35  ;;  %v3082_v22 = vunpack.i.h.bf16 %v4287_v49 }
 0x6e6   : > { %v2128_v27 = vsel %vm2124_vm2, %v3032_v3, %v3106_v34  ;;  %v2129_v44 = vsel %vm2124_vm2, %v3106_v34, %v3107_v4  ;;  %2437 = vmatprep.subr.bf16.mxu0 %v3416_v0  ;;  %v2172_v28 = vsel %vm2167_vm8, %v3116_v55, %v3117_v26  ;;  %v2171_v18 = vsel %vm2167_vm8, %v3036_v50, %v3116_v55 }
 0x6e7   : > { %v2334_v7 = vpack.c.bf16 %v2128_v27, %v2125_v14  ;;  %v4346_v57 = vpop.permute.xlu0 %3119  ;;  %v3110_v37 = vpop.permute.xlu1 %3109  ;;  %v2335_v45 = vpack.c.bf16 %v2129_v44, %v2126_v56  ;;  %v2341_v41 = vpack.c.bf16 %v2175_v52, %v2172_v28  ;;  %v3081_v3 = vunpack.i.l.bf16 %v4287_v49 }
 0x6e8   : > { %v3112_v16 = vunpack.i.h.bf16 %v3110_v37  ;;  %v3111_v1 = vunpack.i.l.bf16 %v3110_v37  ;;  %v2340_v8 = vpack.c.bf16 %v2174_v33, %v2171_v18  ;;  %v3097_v56 = vunpack.i.h.bf16 %v4311_v15 }
 0x6e9   : > { %2396 = vmatprep.subr.bf16.mxu1 %v2335_v45  ;;  %v3086_v55 = vunpack.i.l.bf16 %v4318_v29  ;;  %v2218_v27 = vsel %vm2210_vm9, %v3076_v40, %v3077_v10  ;;  %v3121_v50 = vunpack.i.l.bf16 %v4346_v57 }
 0x6ea   : > { %v2127_v43 = vsel %vm2124_vm2, %v3002_v32, %v3111_v1  ;;  %v2130_v23 = vsel %vm2124_vm2, %v3107_v4, %v3112_v16  ;;  %2397 = vmatpush1.bf16.msra.mxu1 %v2334_v7  ;;  %v2339_v32 = vpack.c.bf16 %v2170_v2, %v4331_v5  ;;  %v2211_v5 = vsel %vm2210_vm9, %v3051_v17, %v3046_v11 }
 0x6eb   : > { %v2336_v51 = vpack.c.bf16 %v2130_v23, %v2127_v43  ;;  %v4362_v31 = vpop.permute.xlu0 %3124  ;;  %v3130_v46 = vpop.permute.xlu1 %3129  ;;  %2398 = vmatprep.subr.bf16.mxu1 %v2338_v25  ;;  %v2255_v16 = vsel %vm2253_vm10, %v3081_v3, %v3082_v22  ;;  %v3092_v1 = vunpack.i.h.bf16 %v4302_v54  ;;  %v2217_v25 = vsel %vm2210_vm9, %v3086_v55, %v3076_v40 }
 0x6ec   : > { %v3132_v36 = vunpack.i.h.bf16 %v3130_v46  ;;  %v3131_v19 = vunpack.i.l.bf16 %v3130_v46  ;;  %v3122_v2 = vunpack.i.h.bf16 %v4346_v57  ;;  %v2254_v23 = vsel %vm2253_vm10, %v3091_v20, %v3081_v3 }
 0x6ed   : > { %2438 = vmatpush1.bf16.msra.mxu0 %v2336_v51  ;;  %v2261_v57 = vsel %vm2253_vm10, %v3096_v59, %v3097_v56  ;;  %v2346_v46 = vpack.c.bf16 %v2254_v23, %v2217_v25  ;;  %v3127_v18 = vunpack.i.h.bf16 %v4362_v31  ;;  %v2864_v25 = vcombine.low %v4210_v13, %v4210_v13 }
 0x6ee   : > { %2399 = vmatpush1.bf16.msra.mxu1 %v2337_v38  ;;  %2439 = vmatprep.subr.bf16.mxu0 %v3416_v0  ;;  %v2173_v35 = vsel %vm2167_vm8, %v3117_v26, %v3131_v19  ;;  %v2176_v34 = vsel %vm2167_vm8, %v2972_v39, %v3132_v36  ;;  %v3087_v39 = vunpack.i.h.bf16 %v4318_v29  ;;  %v2347_v29 = vpack.c.bf16 %v2255_v16, %v2218_v27 }
 0x6ef   : > { %v4378_v4 = vpop.permute.xlu0 %3144  ;;  %v3135_v30 = vpop.permute.xlu1 %3134  ;;  %2400 = vmatprep.subr.bf16.mxu1 %v2341_v41  ;;  %v2342_v37 = vpack.c.bf16 %v2176_v34, %v2173_v35  ;;  %v3126_v36 = vunpack.i.l.bf16 %v4362_v31  ;;  %v2260_v41 = vsel %vm2253_vm10, %v3122_v2, %v3096_v59 }
 0x6f0   : > { %v3137_v14 = vunpack.i.h.bf16 %v3135_v30  ;;  %v3136_v53 = vunpack.i.l.bf16 %v3135_v30  ;;  %v3147_v44 = vunpack.i.h.bf16 %v4378_v4  ;;  %v3146_v7 = vunpack.i.l.bf16 %v4378_v4 }
 0x6f1   : > { %2440 = vmatpush1.bf16.msra.mxu0 %v2339_v32  ;;  %v2219_v28 = vsel %vm2210_vm9, %v3077_v10, %v3087_v39  ;;  %v2256_v10 = vsel %vm2253_vm10, %v3082_v22, %v3092_v1  ;;  %v2298_v30 = vsel %vm2296_vm11, %v3126_v36, %v3127_v18 }
 0x6f2   : > { %v2214_v26 = vsel %vm2210_vm9, %v3052_v6, %v3136_v53  ;;  %2401 = vmatpush1.bf16.msra.mxu1 %v2340_v8  ;;  %2441 = vmatprep.subr.bf16.mxu0 %v3416_v0  ;;  %v2215_v21 = vsel %vm2210_vm9, %v3136_v53, %v3137_v14  ;;  %v2258_v54 = vsel %vm2253_vm10, %v3146_v7, %v3147_v44 }
 0x6f3   : > { %v2343_v15 = vpack.c.bf16 %v2214_v26, %v2211_v5  ;;  %v3140_v45 = vpop.permute.xlu1 %3139  ;;  %v2344_v61 = vpack.c.bf16 %v2215_v21, %v2212_v42  ;;  %v3150_v9 = vpop.permute.xlu0 %3149  ;;  %v2257_v12 = vsel %vm2253_vm10, %v3121_v50, %v3146_v7  ;;  %v2350_v32 = vpack.c.bf16 %v2261_v57, %v2258_v54 }
 0x6f4   : > { %v3142_v52 = vunpack.i.h.bf16 %v3140_v45  ;;  %v3141_v47 = vunpack.i.l.bf16 %v3140_v45  ;;  %v3151_v19 = vunpack.i.l.bf16 %v3150_v9  ;;  %v2348_v42 = vpack.c.bf16 %v2256_v10, %v2219_v28 }
 0x6f5   : > { %2402 = vmatprep.subr.bf16.mxu1 %v2344_v61  ;;  %2442 = vmatpush1.bf16.msra.mxu0 %v2342_v37  ;;  %v2349_v5 = vpack.c.bf16 %v2260_v41, %v2257_v12  ;;  %v3152_v3 = vunpack.i.h.bf16 %v3150_v9 }
 0x6f6   : > { %v2213_v11 = vsel %vm2210_vm9, %v3047_v62, %v3141_v47  ;;  %v2216_v43 = vsel %vm2210_vm9, %v3137_v14, %v3142_v52  ;;  %2403 = vmatpush1.bf16.msra.mxu1 %v2343_v15  ;;  %2443 = vmatprep.subr.bf16.mxu0 %v3416_v0  ;;  %v2297_v22 = vsel %vm2296_vm11, %v3151_v19, %v3126_v36 }
 0x6f7   : > { %v2345_v17 = vpack.c.bf16 %v2216_v43, %v2213_v11  ;;  %v3160_v51 = vpop.permute.xlu1 %3159  ;;  %2404 = vmatprep.subr.bf16.mxu1 %v2347_v29  ;;  %v3155_v40 = vpop.permute.xlu0 %3154 }
 0x6f8   : > { %v3162_v62 = vunpack.i.h.bf16 %v3160_v51  ;;  %v3161_v38 = vunpack.i.l.bf16 %v3160_v51  ;;  %v3157_v33 = vunpack.i.h.bf16 %v3155_v40  ;;  %v3156_v6 = vunpack.i.l.bf16 %v3155_v40 }
 0x6f9   : > { %2444 = vmatpush1.bf16.msra.mxu0 %v2345_v17 }
 0x6fa   : > { %2405 = vmatpush1.bf16.msra.mxu1 %v2346_v46  ;;  %2445 = vmatprep.subr.bf16.mxu0 %v3416_v0  ;;  %v2259_v31 = vsel %vm2253_vm10, %v3147_v44, %v3161_v38  ;;  %v2262_v8 = vsel %vm2253_vm10, %v3097_v56, %v3162_v62  ;;  %v2303_v14 = vsel %vm2296_vm11, %v3156_v6, %v3157_v33  ;;  %v2483_v38 = vld [vmem:[%s4469_s9] sm:$0x7] }
 0x6fb   : > { %v3165_v20 = vpop.permute.xlu1 %3164  ;;  %2406 = vmatprep.subr.bf16.mxu1 %v2350_v32  ;;  %v2351_v53 = vpack.c.bf16 %v2262_v8, %v2259_v31  ;;  %v2295_v7 = vpop.permute.xlu0 %2294  ;;  %v2355_v26 = vpack.c.bf16 %v2303_v14, %v2303_v14  ;;  %vm2484_vm13 = vcmp.gt.f32.partialorder %v2483_v38, 0.5 }
 0x6fc   : > { %v3167_v4 = vunpack.i.h.bf16 %v3165_v20  ;;  %v3166_v49 = vunpack.i.l.bf16 %v3165_v20  ;;  %v2485_v19 = vsel %vm2484_vm13, 1, %v3416_v0 }
 0x6fd   : > { %2446 = vmatpush1.bf16.msra.mxu0 %v2348_v42  ;;  %v2376_v16 = vsel %vm2374_vm12, %v2355_v26, 0  ;;  %v2489_v32 = vrot.slane %v2485_v19, %v797_v60  ;;  %v2493_v40 = vrot.slane %v2485_v19, %v801_v58  ;;  %v2497_v10 = vrot.slane %v2485_v19, %v805_v63 }
 0x6fe   : > { %v2300_v35 = vsel %vm2296_vm11, %v3152_v3, %v3166_v49  ;;  %2407 = vmatpush1.bf16.msra.mxu1 %v2349_v5  ;;  %2447 = vmatprep.subr.bf16.mxu0 %v3416_v0  ;;  %v2301_v34 = vsel %vm2296_vm11, %v3166_v49, %v3167_v4 }
 0x6ff   : > { %v2352_v59 = vpack.c.bf16 %v2300_v35, %v2297_v22  ;;  %v3170_v55 = vpop.permute.xlu1 %3169  ;;  %v2353_v56 = vpack.c.bf16 %v2301_v34, %v2298_v30  ;;  %vm2498_vm14 = vcmp.eq.s32.totalorder %v2489_v32, 1  ;;  %vm2499_vm0 = vcmp.eq.s32.totalorder %v2493_v40, 1 }
 0x700   : > { %v3172_v27 = vunpack.i.h.bf16 %v3170_v55  ;;  %v3171_v44 = vunpack.i.l.bf16 %v3170_v55  ;;  %vm2500_vm3 = vcmp.eq.s32.totalorder %v2497_v10, 1  ;;  %v3431_v34 = vmov 0.0  }
 0x701   : > { %2408 = vmatprep.subr.bf16.mxu1 %v2353_v56  ;;  %2448 = vmatpush1.bf16.msra.mxu0 %v2351_v53 }
 0x702   : > { %v2299_v21 = vsel %vm2296_vm11, %v3127_v18, %v3171_v44  ;;  %v2302_v39 = vsel %vm2296_vm11, %v3167_v4, %v3172_v27  ;;  %2409 = vmatpush1.bf16.msra.mxu1 %v2352_v59  ;;  %2449 = vmatprep.subr.bf16.mxu0 %v3416_v0  ;;  %v2515_v59 = vld [vmem:[%s4470_s10] sm:$0xff] }
 0x703   : > { %v2354_v37 = vpack.c.bf16 %v2302_v39, %v2299_v21  ;;  %v2293_v15 = vpop.permute.xlu1 %2292 }
 0x704   : > { %v2304_v45 = vsel %vm2296_vm11, %v3157_v33, %v2293_v15  ;;  %v2305_v61 = vsel %vm2296_vm11, %v2293_v15, %v2295_v7 }
 0x705   : > { %v2356_v52 = vpack.c.bf16 %v2304_v45, %v2304_v45  ;;  %v2357_v47 = vpack.c.bf16 %v2305_v61, %v2305_v61  ;;  %2450 = vmatpush1.bf16.msra.mxu0 %v2354_v37 }
 0x706   : > { %2451 = vmatprep.subr.bf16.mxu0 %v3416_v0 }
 0x707   : > { %2866 = vmatprep.subr.msk.bf16.mxu1 %vm2374_vm12, %v2356_v52  ;;  %v2382_v1 = vsel %vm2374_vm12, %v2357_v47, 0 }
 0x708   : > { %2411 = vmatpush1.bf16.msra.mxu1 %v2376_v16 }
 0x709   : > { %2452 = vmatpush1.bf16.msra.mxu0 %v2382_v1  ;;  %2890 = vmatprep.subr.mxu1 %v3431_v34 }
 0x70b   : > { %2417 = vmatmul.mubr.bf16.vlgmr.msra.gmra.mrb[8].mxu1 %v2864_v25 }
 0x70c   : > { %2458 = vmatmul.mubr.bf16.vlgmr.msra.gmra.mrb[40].mxu0 %v2864_v25  ;;  %2892 = vmatprep.mubr.msk.f32.mxu1 %vm3432_vm6, %v3431_v34 }
 0x714   : > { %v2362_v2 = vpop.permute.xlu1 %2361 }
 0x7de   : > { %v2418_v9 = vpop.f32.mrb[8].mxu1 }
 0x7df   : > { %v2419_v29 = vadd.f32 %v2418_v9, %v2362_v2  ;;  %v2420_v50 = vpop.f32.mrb[9].mxu1  ;;  %v2459_v11 = vpop.f32.mrb[40].mxu0 }
 0x7e0   : > { %v2421_v43 = vadd.f32 %v2420_v50, %v2362_v2  ;;  %v2460_v54 = vadd.f32 %v2459_v11, %v2362_v2  ;;  %v2422_v23 = vpop.f32.mrb[10].mxu1  ;;  %v2461_v28 = vpop.f32.mrb[41].mxu0 }
 0x7e1   : > { %v2468_v17 = vmin.f32 %v2419_v29, 0.0  ;;  %v2423_v51 = vpop.f32.mrb[11].mxu1  ;;  %v2462_v57 = vpop.f32.mrb[42].mxu0  ;;  %vm2465_vm15 = vcmp.gt.f32.partialorder %v2419_v29, 0.0 }
 0x7e2   : > { %v2469_v46 = vmin.f32 %v2421_v43, 0.0  ;;  %v2470_v12 = vmin.f32 %v2460_v54, 0.0  ;;  %v2463_v62 = vpop.f32.mrb[43].mxu0  ;;  %vm2466_vm1 = vcmp.gt.f32.partialorder %v2421_v43, 0.0  ;;  %vm2467_vm5 = vcmp.gt.f32.partialorder %v2460_v54, 0.0 }
 0x7e3   : > { %v2471_v13 = vmul.f32 1.442695, %v2468_v17 }
 0x7e4   : > { %v2473_v18 = vmul.f32 1.442695, %v2469_v46  ;;  %v2475_v36 = vmul.f32 1.442695, %v2470_v12 }
 0x7e5   : > { %3398 = vpow2.f32 %v2471_v13 }
 0x7e6   : > { %3400 = vpow2.f32 %v2473_v18 }
 0x7e7   : > { %3402 = vpow2.f32 %v2475_v36 }
 0x7ef   : > { %v3399_v41 = vpop.eup %3398 }
 0x7f0   : > { %v3401_v33 = vpop.eup %3400  ;;  %v2869_v6 = vadd.f32 -1.0, %v3399_v41 }
 0x7f1   : > { %v3403_v42 = vpop.eup %3402  ;;  %v2870_v5 = vadd.f32 -1.0, %v3401_v33 }
 0x7f2   : > { %v2480_v3 = vsel %vm2465_vm15, %v2419_v29, %v2869_v6  ;;  %v2871_v0 = vadd.f32 -1.0, %v3403_v42 }
 0x7f3   : > { %v2481_v20 = vsel %vm2466_vm1, %v2421_v43, %v2870_v5  ;;  %v2501_v60 = vsel %vm2498_vm14, %v2480_v3, 0.0 }
 0x7f4   : > { %v2482_v31 = vsel %vm2467_vm5, %v2460_v54, %v2871_v0  ;;  %v2502_v58 = vsel %vm2499_vm0, %v2481_v20, 0.0  ;;  %v2508_v8 = vmul.f32 %v2501_v60, %v2501_v60 }
 0x7f5   : > { %v2503_v48 = vsel %vm2500_vm3, %v2482_v31, 0.0  ;;  %v2504_v63 = vadd.f32 %v2502_v58, %v2501_v60  ;;  %v2509_v4 = vmul.f32 %v2502_v58, %v2502_v58 }
 0x7f6   : > { %v2510_v22 = vmul.f32 %v2503_v48, %v2503_v48 }
 0x7f7   : > { %v2505_v49 = vadd.f32 %v2504_v63, %v2503_v48  ;;  %v2511_v30 = vadd.f32 %v2509_v4, %v2508_v8 }
 0x7f9   : > { %2506 = vadd.xlane.f32.xlu0 %v2505_v49  ;;  %v2512_v35 = vadd.f32 %v2511_v30, %v2510_v22 }
 0x7fb   : > { %2513 = vadd.xlane.f32.xlu1 %v2512_v35 }
 0x886   : > { %v2507_v14 = vpop.xlane.xlu0 %2506 }
 0x888   : > { %v2514_v53 = vpop.xlane.xlu1 %2513 }
 0x889   : > { %v2516_v55 = vsel %vm853_vm4, %v2507_v14, %v2514_v53 }
 0x88a   : > { %2891 = vmatpush3.msra.mxu1 %v2516_v55 }
 0x88b   : > { %2893 = vmatmul.mubr.msk.f32.vlgmr.msra.gmra.mrb[2].mxu1 %vm2517_vm7, %v2515_v59 }
 0x95e   : > { %v2587_v56 = vpop.f32.mrb[2].mxu1 }
 0x95f   : > { %v2591_v27 = vmul.f32 0.00390625, %v2587_v56  ;;  %v2894_v44 = vpop.f32.mrb[3].mxu1 }
 0x961   : > { %v2592_v7 = vmul.f32 %v2591_v27, %v2591_v27 }
 0x963   : > { %2594 = vrot.lane.b32.xlu0 %v2592_v7, %s3420_s20  ;;  %s2907_s20 = smul.u32 24, %s4473_s18 }
 0x965   : > { %s406_s30 = scalar_lea.vmem %s4471_s11, %s2907_s20 }
 0x9d5   : > { %v2595_v26 = vpop.permute.xlu0 %2594 }
 0x9d6   : > { %v2597_v21 = vsub.f32 %v2591_v27, %v2595_v26 }
 0x9d8   : > { %v2598_v39 = vadd.f32 1e-05, %v2597_v21 }
 0x9da   : > { %3404 = vrsqrt.f32 %v2598_v39 }
 0x9e4   : > { %v3405_v37 = vpop.eup %3404 }
 0x9e5   : > { %v2600_v15 = vmul.f32 %v3405_v37, %v4218_v24 }
 0x9e7   : > { %2602 = vrot.lane.b32.xlu1 %v2600_v15, %s3417_s28 }
 0x9eb   : > { %2612 = vperm.xlu1 %3174, %v2600_v15  }
 0xa59   : > { %v2603_v45 = vpop.permute.xlu1 %2602 }
 0xa5a   : > { %v2605_v61 = vmul.f32 %v2603_v45, %v2591_v27 }
 0xa5c   : > { %2607 = vrot.lane.b32.xlu0 %v2605_v61, %s3422_s21 }
 0xa6a   : > { %v2613_v16 = vpop.permute.xlu1 %2612 }
 0xa6b   : > { %v2615_v1 = vmul.f32 %v2613_v16, %v2480_v3  ;;  %v2616_v25 = vmul.f32 %v2613_v16, %v2481_v20  ;;  %v2617_v2 = vmul.f32 %v2613_v16, %v2482_v31 }
 0xace   : > { %v2608_v52 = vpop.permute.xlu0 %2607 }
 0xacf   : > { %v2610_v47 = vsub.f32 %v4218_v24, %v2608_v52 }
 0xad1   : > { %2620 = vperm.xlu0 %2937, %v2610_v47  }
 0xb50   : > { %v2621_v9 = vpop.permute.xlu0 %2620 }
 0xb51   : > { %v2623_v29 = vadd.f32 %v2621_v9, %v2615_v1  ;;  %v2624_v50 = vadd.f32 %v2621_v9, %v2616_v25  ;;  %v2625_v11 = vadd.f32 %v2621_v9, %v2617_v2 }
 0xb53   : > { %2626 = vst [vmem:[%s406_s30] sm:$0xff] %v2623_v29  ;;  %2627 = vst [vmem:[%s406_s30 + $0x8] sm:$0xff] %v2624_v50 }
 0xb54   : > { %2628 = vst [vmem:[%s406_s30 + $0x10] sm:$0xff] %v2625_v11 }
 0xb55 PF: > { %s21_s17 = sadd.s32 1, %s3414_s17  }
 0xb56   : > { %p18_p4 = scmp.ge.s32.totalorder %s21_s17, 4  }
 0xb58   :  { %20 = sbr.rel (!%p18_p4) target bundleno = 1 (0x1), region = 97 }

</bundles_post_ra>
